<compile_context>
chip_gen: v7x
topology: tpu7x:2x2x1
jax: 0.10.0
libtpu: 0.0.40
codegen_flags: <defaults>
</compile_context>

<pallas_src>
import functools

import numpy as np
import jax
import jax.numpy as jnp
from jax.experimental import pallas as pl
from jax.experimental.pallas import tpu as pltpu

# ---- hyper-parameters (MS_SSIM_L1_LOSS.__init__ defaults) -------------------
GAUSSIAN_SIGMAS = (0.5, 1.0, 2.0, 4.0, 8.0)
DATA_RANGE = 1.0
K = (0.01, 0.03)
C1 = (K[0] * DATA_RANGE) ** 2
C2 = (K[1] * DATA_RANGE) ** 2
ALPHA = 0.025
COMPENSATION = 200.0
FILTER_SIZE = int(4 * GAUSSIAN_SIGMAS[-1] + 1)   # 33
PAD = int(2 * GAUSSIAN_SIGMAS[-1])               # 16
NUM_SIGMA = len(GAUSSIAN_SIGMAS)


# ---- deterministic "weight" construction (glue, plain numpy) ----------------
def _gauss_1d(size, sigma):
    coords = np.arange(size, dtype=np.float32) - size // 2
    g = np.exp(-(coords ** 2) / (2.0 * sigma ** 2))
    return (g / g.sum()).astype(np.float32)


def _band_matrix(n, g, pad):
    # A[i, r] = g[r - i + pad] within kernel support, else 0, so that a
    # same-padded 1-D cross-correlation is out[i] = sum_r A[i, r] * v[r].
    idx = np.arange(n)
    diff = idx[None, :] - idx[:, None] + pad
    valid = (diff >= 0) & (diff < len(g))
    A = np.where(valid, g[np.clip(diff, 0, len(g) - 1)], np.float32(0.0))
    return A.astype(np.float32)


def _band_stack_t(n):
    # transposed band matrices, one per sigma (A is symmetric; transpose kept
    # for clarity since the kernel always right-multiplies).
    return np.stack(
        [_band_matrix(n, _gauss_1d(FILTER_SIZE, s), PAD).T for s in GAUSSIAN_SIGMAS],
        axis=0,
    )  # (NUM_SIGMA, n, n)


# ---- Pallas kernel -----------------------------------------------------------
def _ms_ssim_l1_kernel(aht_ref, awt_ref, x_ref, y_ref, out_ref, *, bt):
    # aht_ref : (S, H, H) bf16  transposed row-conv band matrices
    # awt_ref : (S, W, W) bf16  transposed column-conv band matrices
    # x_ref, y_ref : (bt, H, W) f32 block of batch elements
    # out_ref : (1, 1, 1) f32 partial sum of loss_mix over this block
    _, h, w = x_ref.shape
    x = x_ref[...].reshape(bt * h, w)
    y = y_ref[...].reshape(bt * h, w)

    xx = x * x
    yy = y * y
    xy = x * y
    ad = jnp.abs(x - y)                       # F.l1_loss(..., reduction='none')

    # Stack conv operands along the M (sublane) axis: one big matmul per conv
    # side per sigma.  bf16 operands, f32 accumulation on the MXU.
    stack5_f32 = jnp.concatenate([x, y, xx, yy, xy], axis=0)      # (5*bt*H, W)
    stack6_f32 = jnp.concatenate([stack5_f32, ad], axis=0)        # (6*bt*H, W)
    stack5 = stack5_f32.astype(jnp.bfloat16)
    stack6 = stack6_f32.astype(jnp.bfloat16)

    pics = None
    lM = None
    gl1 = None
    for s in range(NUM_SIGMA):                # static unroll over the 5 sigmas
        last = s == NUM_SIGMA - 1
        src = stack6 if last else stack5      # |x-y| conv only needed at sigma=8
        n_op = 6 if last else 5

        # column conv:  (n_op*bt*H, W) @ (W, W)   -> M = n_op*bt*H
        t = jnp.dot(src, awt_ref[s], preferred_element_type=jnp.float32)
        # minor-dims transpose (XLU, overlaps MXU) so the row conv also has a
        # big M instead of M = H.
        t = jnp.swapaxes(t.reshape(n_op * bt, h, w), 1, 2)        # (n_op*bt, W, H)
        # row conv:     (n_op*bt*W, H) @ (H, H)   -> M = n_op*bt*W
        g = jnp.dot(
            t.reshape(n_op * bt * w, h).astype(jnp.bfloat16),
            aht_ref[s],
            preferred_element_type=jnp.float32,
        ).reshape(n_op * bt, w, h)            # conv results, (op*batch, W, H) layout

        mux = g[0 * bt:1 * bt]
        muy = g[1 * bt:2 * bt]
        cxx = g[2 * bt:3 * bt]
        cyy = g[3 * bt:4 * bt]
        cxy = g[4 * bt:5 * bt]

        mux2 = mux * mux
        muy2 = muy * muy
        muxy = mux * muy
        sx2 = cxx - mux2
        sy2 = cyy - muy2
        sxy = cxy - muxy

        # exact division kept (approx reciprocal would perturb the cs/l product
        # chain); all SSIM elementwise math stays in f32.
        cs = (2.0 * sxy + C2) / (sx2 + sy2 + C2)
        cs3 = cs * cs * cs                    # 3 identical masks per sigma
        pics = cs3 if pics is None else pics * cs3

        if last:
            l = (2.0 * muxy + C1) / (mux2 + muy2 + C1)
            lM = l * l * l                    # lM uses the last 3 (identical) channels
            gl1 = g[5 * bt:6 * bt]            # mean over 3 identical channels == itself

    loss_ms_ssim = 1.0 - lM * pics
    loss_mix = COMPENSATION * (
        ALPHA * loss_ms_ssim + (1.0 - ALPHA) * gl1 * (1.0 / DATA_RANGE)
    )
    # in-kernel reduction: only one f32 partial sum per grid step goes to HBM
    out_ref[...] = jnp.broadcast_to(jnp.sum(loss_mix), (1, 1, 1))


# ---- wrapper -----------------------------------------------------------------
def _choose_block_batch(b, h, w):
    """Pack several batch elements per grid step when images are small."""
    budget = 8 * 1024 * 1024                         # rough per-step working set
    per_plane = max(h, 8) * max(w, 128) * 4          # lane-padded f32 plane
    cap = max(1, budget // (24 * per_plane))
    divisors = [d for d in range(1, b + 1) if b % d == 0 and d <= cap]
    # keep >= 2 grid steps when possible so both v7x TensorCores get work
    preferred = [d for d in divisors if b // d >= 2]
    return max(preferred) if preferred else max(divisors)


def _pad_up(n, m):
    return ((n + m - 1) // m) * m


def ms_ssim_l1_loss(x, y):
    """x, y: (B, 1, H, W) float32 NCHW. Returns the scalar loss (matches torch)."""
    b, c, h, w = x.shape
    assert c == 1, "groups=1 conv with (15,1,33,33) weights requires C == 1"
    assert h % 8 == 0 and w % 8 == 0, "kernel tiling assumes H, W multiples of 8"
    x3 = x[:, 0].astype(jnp.float32)
    y3 = y[:, 0].astype(jnp.float32)

    # bf16 band matrices: half the mask VMEM/HBM footprint; the MXU multiplies
    # in bf16 at default precision anyway (accumulation stays f32).
    aht = jnp.asarray(_band_stack_t(h)).astype(jnp.bfloat16)   # (S, H, H)
    awt = jnp.asarray(_band_stack_t(w)).astype(jnp.bfloat16)   # (S, W, W)

    bt = _choose_block_batch(b, h, w)
    grid = (b // bt,)

    # explicit scoped-VMEM budget (defaults: 16 MiB v5e, 32 MiB v6e/v7x)
    mask_bytes = 2 * NUM_SIGMA * (
        _pad_up(h, 8) * _pad_up(h, 128) + _pad_up(w, 8) * _pad_up(w, 128)) * 2
    img_bytes = 2 * 2 * bt * _pad_up(h, 8) * _pad_up(w, 128) * 4
    work_bytes = 40 * bt * _pad_up(h, 8) * _pad_up(w, 128) * 4
    vmem_limit = int(min(64 * 2 ** 20,
                         max(16 * 2 ** 20,
                             mask_bytes + img_bytes + work_bytes + (4 << 20))))

    # advisory cost estimate so XLA schedules around the custom call
    flops = 2 * b * h * w * (h + w) * (5 * (NUM_SIGMA - 1) + 6) \
        + 40 * b * h * w * NUM_SIGMA
    bytes_accessed = 2 * b * h * w * 4 + mask_bytes // 2 + grid[0] * 4

    partials = pl.pallas_call(
        functools.partial(_ms_ssim_l1_kernel, bt=bt),
        out_shape=jax.ShapeDtypeStruct((grid[0], 1, 1), jnp.float32),
        grid=grid,
        in_specs=[
            pl.BlockSpec((NUM_SIGMA, h, h), lambda i: (0, 0, 0)),
            pl.BlockSpec((NUM_SIGMA, w, w), lambda i: (0, 0, 0)),
            pl.BlockSpec((bt, h, w), lambda i: (i, 0, 0)),
            pl.BlockSpec((bt, h, w), lambda i: (i, 0, 0)),
        ],
        out_specs=pl.BlockSpec((1, 1, 1), lambda i: (i, 0, 0)),
        compiler_params=pltpu.CompilerParams(
            dimension_semantics=("parallel",),
            vmem_limit_bytes=vmem_limit,
        ),
        cost_estimate=pl.CostEstimate(
            flops=int(flops), transcendentals=0,
            bytes_accessed=int(bytes_accessed)),
    )(aht, awt, x3, y3)

    # only the trivial final normalization stays in XLA glue
    return jnp.sum(partials) / (b * h * w)


# ---- pure-JAX reference (direct conv, mirrors the torch code) ----------------
def _reference_loss(x, y):
    g_masks = np.zeros((3 * NUM_SIGMA, 1, FILTER_SIZE, FILTER_SIZE), np.float32)
    for idx, sigma in enumerate(GAUSSIAN_SIGMAS):
        g1 = _gauss_1d(FILTER_SIZE, sigma)
        g2 = np.outer(g1, g1)
        g_masks[3 * idx + 0, 0] = g2
        g_masks[3 * idx + 1, 0] = g2
        g_masks[3 * idx + 2, 0] = g2
    g_masks = jnp.asarray(g_masks)

    def conv(img, kern):
        return jax.lax.conv_general_dilated(
            img, kern, window_strides=(1, 1),
            padding=[(PAD, PAD), (PAD, PAD)],
            dimension_numbers=("NCHW", "OIHW", "NCHW"))

    mux = conv(x, g_masks)
    muy = conv(y, g_masks)
    mux2, muy2, muxy = mux * mux, muy * muy, mux * muy
    sigx2 = conv(x * x, g_masks) - mux2
    sigy2 = conv(y * y, g_masks) - muy2
    sigxy = conv(x * y, g_masks) - muxy
    l = (2 * muxy + C1) / (mux2 + muy2 + C1)
    cs = (2 * sigxy + C2) / (sigx2 + sigy2 + C2)
    lM = l[:, -1] * l[:, -2] * l[:, -3]
    PIcs = jnp.prod(cs, axis=1)
    loss_ms_ssim = 1 - lM * PIcs
    gaussian_l1 = conv(jnp.abs(x - y), g_masks[-3:]).mean(axis=1)
    loss_mix = COMPENSATION * (
        ALPHA * loss_ms_ssim + (1 - ALPHA) * gaussian_l1 / DATA_RANGE
    )
    return loss_mix.mean()


if __name__ == "__main__":
    key = jax.random.PRNGKey(0)
    k1, k2 = jax.random.split(key)
    b, c, h, w = 2, 1, 16, 16
    x = jax.random.uniform(k1, (b, c, h, w), dtype=jnp.float32)
    y = jax.random.uniform(k2, (b, c, h, w), dtype=jnp.float32)

    out = jax.block_until_ready(ms_ssim_l1_loss(x, y))
    ref = jax.block_until_ready(_reference_loss(x, y))

    # bf16 MXU operands with f32 accumulation (same precision class as the
    # TPU-default XLA conv in the reference): 2e-3 relative tolerance.
    err = abs(float(out) - float(ref))
    assert err <= 2e-3 * max(1.0, abs(float(ref))), (float(out), float(ref))
    print("KERNEL_OK")
</pallas_src>

<mosaic_0001>
module attributes {stable_mosaic.version = 11 : i64} {
  func.func @_ms_ssim_l1_kernel(%arg0: i32, %arg1: memref<5x16x16xbf16, #tpu.memory_space<vmem>>, %arg2: memref<5x16x16xbf16, #tpu.memory_space<vmem>>, %arg3: memref<1x16x16xf32, #tpu.memory_space<vmem>>, %arg4: memref<1x16x16xf32, #tpu.memory_space<vmem>>, %arg5: memref<1x1x1xf32, #tpu.memory_space<vmem>>) attributes {dimension_semantics = [#tpu.dimension_semantics<parallel>], iteration_bounds = array<i64: 2>, scalar_prefetch = 0 : i64, scratch_operands = 0 : i64, tpu.core_type = #tpu.core_type<tc>, window_params = [{pipeline_mode = #tpu.pipeline_mode<synchronous>, transform_indices = @transform_0, window_bounds = array<i64: 5, 16, 16>}, {pipeline_mode = #tpu.pipeline_mode<synchronous>, transform_indices = @transform_1, window_bounds = array<i64: 5, 16, 16>}, {transform_indices = @transform_2, window_bounds = array<i64: 1, 16, 16>}, {transform_indices = @transform_3, window_bounds = array<i64: 1, 16, 16>}, {transform_indices = @transform_4, window_bounds = array<i64: 1, 1, 1>}]} {
    %c0 = arith.constant 0 : index
    %c0_0 = arith.constant 0 : index
    %c0_1 = arith.constant 0 : index
    %0 = vector.load %arg3[%c0, %c0_0, %c0_1] : memref<1x16x16xf32, #tpu.memory_space<vmem>>, vector<1x16x16xf32>
    %1 = vector.shape_cast %0 : vector<1x16x16xf32> to vector<16x16xf32>
    %c0_2 = arith.constant 0 : index
    %c0_3 = arith.constant 0 : index
    %c0_4 = arith.constant 0 : index
    %2 = vector.load %arg4[%c0_2, %c0_3, %c0_4] : memref<1x16x16xf32, #tpu.memory_space<vmem>>, vector<1x16x16xf32>
    %3 = vector.shape_cast %2 : vector<1x16x16xf32> to vector<16x16xf32>
    %4 = arith.mulf %1, %1 : vector<16x16xf32>
    %5 = arith.mulf %3, %3 : vector<16x16xf32>
    %6 = arith.mulf %1, %3 : vector<16x16xf32>
    %7 = arith.subf %1, %3 : vector<16x16xf32>
    %8 = math.absf %7 : vector<16x16xf32>
    %9 = tpu.concatenate %1, %3, %4, %5, %6 in 0 : vector<16x16xf32>, vector<16x16xf32>, vector<16x16xf32>, vector<16x16xf32>, vector<16x16xf32> -> vector<80x16xf32>
    %10 = tpu.concatenate %9, %8 in 0 : vector<80x16xf32>, vector<16x16xf32> -> vector<96x16xf32>
    %11 = arith.truncf %9 : vector<80x16xf32> to vector<80x16xbf16>
    %12 = arith.truncf %10 : vector<96x16xf32> to vector<96x16xbf16>
    %c0_5 = arith.constant 0 : index
    %c0_6 = arith.constant 0 : index
    %c0_7 = arith.constant 0 : index
    %13 = vector.load %arg2[%c0_5, %c0_6, %c0_7] : memref<5x16x16xbf16, #tpu.memory_space<vmem>>, vector<1x16x16xbf16>
    %14 = vector.shape_cast %13 : vector<1x16x16xbf16> to vector<16x16xbf16>
    %cst = arith.constant dense<0.000000e+00> : vector<80x16xf32>
    %15 = tpu.matmul %11, %14, %cst {dimension_numbers = #tpu.dot_dimension_numbers<[1], [0], [0], [1], [0, 0, 1, 1], [], []>} : vector<80x16xbf16>, vector<16x16xbf16>, vector<80x16xf32> -> vector<80x16xf32>
    %16 = vector.shape_cast %15 : vector<80x16xf32> to vector<5x16x16xf32>
    %17 = tpu.transpose %16, [0, 2, 1] : vector<5x16x16xf32> -> vector<5x16x16xf32>
    %18 = vector.shape_cast %17 : vector<5x16x16xf32> to vector<80x16xf32>
    %19 = arith.truncf %18 : vector<80x16xf32> to vector<80x16xbf16>
    %c0_8 = arith.constant 0 : index
    %c0_9 = arith.constant 0 : index
    %c0_10 = arith.constant 0 : index
    %20 = vector.load %arg1[%c0_8, %c0_9, %c0_10] : memref<5x16x16xbf16, #tpu.memory_space<vmem>>, vector<1x16x16xbf16>
    %21 = vector.shape_cast %20 : vector<1x16x16xbf16> to vector<16x16xbf16>
    %cst_11 = arith.constant dense<0.000000e+00> : vector<80x16xf32>
    %22 = tpu.matmul %19, %21, %cst_11 {dimension_numbers = #tpu.dot_dimension_numbers<[1], [0], [0], [1], [0, 0, 1, 1], [], []>} : vector<80x16xbf16>, vector<16x16xbf16>, vector<80x16xf32> -> vector<80x16xf32>
    %23 = vector.shape_cast %22 : vector<80x16xf32> to vector<5x16x16xf32>
    %24 = vector.extract_strided_slice %23 {offsets = [0, 0, 0], sizes = [1, 16, 16], strides = [1, 1, 1]} : vector<5x16x16xf32> to vector<1x16x16xf32>
    %25 = vector.extract_strided_slice %23 {offsets = [1, 0, 0], sizes = [1, 16, 16], strides = [1, 1, 1]} : vector<5x16x16xf32> to vector<1x16x16xf32>
    %26 = vector.extract_strided_slice %23 {offsets = [2, 0, 0], sizes = [1, 16, 16], strides = [1, 1, 1]} : vector<5x16x16xf32> to vector<1x16x16xf32>
    %27 = vector.extract_strided_slice %23 {offsets = [3, 0, 0], sizes = [1, 16, 16], strides = [1, 1, 1]} : vector<5x16x16xf32> to vector<1x16x16xf32>
    %28 = vector.extract_strided_slice %23 {offsets = [4, 0, 0], sizes = [1, 16, 16], strides = [1, 1, 1]} : vector<5x16x16xf32> to vector<1x16x16xf32>
    %29 = arith.mulf %24, %24 : vector<1x16x16xf32>
    %30 = arith.mulf %25, %25 : vector<1x16x16xf32>
    %31 = arith.mulf %24, %25 : vector<1x16x16xf32>
    %32 = arith.subf %26, %29 : vector<1x16x16xf32>
    %33 = arith.subf %27, %30 : vector<1x16x16xf32>
    %34 = arith.subf %28, %31 : vector<1x16x16xf32>
    %cst_12 = arith.constant 2.000000e+00 : f32
    %35 = vector.broadcast %cst_12 : f32 to vector<1x16x16xf32>
    %36 = arith.mulf %35, %34 : vector<1x16x16xf32>
    %cst_13 = arith.constant 8.99999984E-4 : f32
    %37 = vector.broadcast %cst_13 : f32 to vector<1x16x16xf32>
    %38 = arith.addf %36, %37 : vector<1x16x16xf32>
    %39 = arith.addf %32, %33 : vector<1x16x16xf32>
    %cst_14 = arith.constant 8.99999984E-4 : f32
    %40 = vector.broadcast %cst_14 : f32 to vector<1x16x16xf32>
    %41 = arith.addf %39, %40 : vector<1x16x16xf32>
    %42 = arith.divf %38, %41 : vector<1x16x16xf32>
    %43 = arith.mulf %42, %42 : vector<1x16x16xf32>
    %44 = arith.mulf %43, %42 : vector<1x16x16xf32>
    %c1 = arith.constant 1 : index
    %c0_15 = arith.constant 0 : index
    %c0_16 = arith.constant 0 : index
    %45 = vector.load %arg2[%c1, %c0_15, %c0_16] : memref<5x16x16xbf16, #tpu.memory_space<vmem>>, vector<1x16x16xbf16>
    %46 = vector.shape_cast %45 : vector<1x16x16xbf16> to vector<16x16xbf16>
    %cst_17 = arith.constant dense<0.000000e+00> : vector<80x16xf32>
    %47 = tpu.matmul %11, %46, %cst_17 {dimension_numbers = #tpu.dot_dimension_numbers<[1], [0], [0], [1], [0, 0, 1, 1], [], []>} : vector<80x16xbf16>, vector<16x16xbf16>, vector<80x16xf32> -> vector<80x16xf32>
    %48 = vector.shape_cast %47 : vector<80x16xf32> to vector<5x16x16xf32>
    %49 = tpu.transpose %48, [0, 2, 1] : vector<5x16x16xf32> -> vector<5x16x16xf32>
    %50 = vector.shape_cast %49 : vector<5x16x16xf32> to vector<80x16xf32>
    %51 = arith.truncf %50 : vector<80x16xf32> to vector<80x16xbf16>
    %c1_18 = arith.constant 1 : index
    %c0_19 = arith.constant 0 : index
    %c0_20 = arith.constant 0 : index
    %52 = vector.load %arg1[%c1_18, %c0_19, %c0_20] : memref<5x16x16xbf16, #tpu.memory_space<vmem>>, vector<1x16x16xbf16>
    %53 = vector.shape_cast %52 : vector<1x16x16xbf16> to vector<16x16xbf16>
    %cst_21 = arith.constant dense<0.000000e+00> : vector<80x16xf32>
    %54 = tpu.matmul %51, %53, %cst_21 {dimension_numbers = #tpu.dot_dimension_numbers<[1], [0], [0], [1], [0, 0, 1, 1], [], []>} : vector<80x16xbf16>, vector<16x16xbf16>, vector<80x16xf32> -> vector<80x16xf32>
    %55 = vector.shape_cast %54 : vector<80x16xf32> to vector<5x16x16xf32>
    %56 = vector.extract_strided_slice %55 {offsets = [0, 0, 0], sizes = [1, 16, 16], strides = [1, 1, 1]} : vector<5x16x16xf32> to vector<1x16x16xf32>
    %57 = vector.extract_strided_slice %55 {offsets = [1, 0, 0], sizes = [1, 16, 16], strides = [1, 1, 1]} : vector<5x16x16xf32> to vector<1x16x16xf32>
    %58 = vector.extract_strided_slice %55 {offsets = [2, 0, 0], sizes = [1, 16, 16], strides = [1, 1, 1]} : vector<5x16x16xf32> to vector<1x16x16xf32>
    %59 = vector.extract_strided_slice %55 {offsets = [3, 0, 0], sizes = [1, 16, 16], strides = [1, 1, 1]} : vector<5x16x16xf32> to vector<1x16x16xf32>
    %60 = vector.extract_strided_slice %55 {offsets = [4, 0, 0], sizes = [1, 16, 16], strides = [1, 1, 1]} : vector<5x16x16xf32> to vector<1x16x16xf32>
    %61 = arith.mulf %56, %56 : vector<1x16x16xf32>
    %62 = arith.mulf %57, %57 : vector<1x16x16xf32>
    %63 = arith.mulf %56, %57 : vector<1x16x16xf32>
    %64 = arith.subf %58, %61 : vector<1x16x16xf32>
    %65 = arith.subf %59, %62 : vector<1x16x16xf32>
    %66 = arith.subf %60, %63 : vector<1x16x16xf32>
    %cst_22 = arith.constant 2.000000e+00 : f32
    %67 = vector.broadcast %cst_22 : f32 to vector<1x16x16xf32>
    %68 = arith.mulf %67, %66 : vector<1x16x16xf32>
    %cst_23 = arith.constant 8.99999984E-4 : f32
    %69 = vector.broadcast %cst_23 : f32 to vector<1x16x16xf32>
    %70 = arith.addf %68, %69 : vector<1x16x16xf32>
    %71 = arith.addf %64, %65 : vector<1x16x16xf32>
    %cst_24 = arith.constant 8.99999984E-4 : f32
    %72 = vector.broadcast %cst_24 : f32 to vector<1x16x16xf32>
    %73 = arith.addf %71, %72 : vector<1x16x16xf32>
    %74 = arith.divf %70, %73 : vector<1x16x16xf32>
    %75 = arith.mulf %74, %74 : vector<1x16x16xf32>
    %76 = arith.mulf %75, %74 : vector<1x16x16xf32>
    %77 = arith.mulf %44, %76 : vector<1x16x16xf32>
    %c2 = arith.constant 2 : index
    %c0_25 = arith.constant 0 : index
    %c0_26 = arith.constant 0 : index
    %78 = vector.load %arg2[%c2, %c0_25, %c0_26] : memref<5x16x16xbf16, #tpu.memory_space<vmem>>, vector<1x16x16xbf16>
    %79 = vector.shape_cast %78 : vector<1x16x16xbf16> to vector<16x16xbf16>
    %cst_27 = arith.constant dense<0.000000e+00> : vector<80x16xf32>
    %80 = tpu.matmul %11, %79, %cst_27 {dimension_numbers = #tpu.dot_dimension_numbers<[1], [0], [0], [1], [0, 0, 1, 1], [], []>} : vector<80x16xbf16>, vector<16x16xbf16>, vector<80x16xf32> -> vector<80x16xf32>
    %81 = vector.shape_cast %80 : vector<80x16xf32> to vector<5x16x16xf32>
    %82 = tpu.transpose %81, [0, 2, 1] : vector<5x16x16xf32> -> vector<5x16x16xf32>
    %83 = vector.shape_cast %82 : vector<5x16x16xf32> to vector<80x16xf32>
    %84 = arith.truncf %83 : vector<80x16xf32> to vector<80x16xbf16>
    %c2_28 = arith.constant 2 : index
    %c0_29 = arith.constant 0 : index
    %c0_30 = arith.constant 0 : index
    %85 = vector.load %arg1[%c2_28, %c0_29, %c0_30] : memref<5x16x16xbf16, #tpu.memory_space<vmem>>, vector<1x16x16xbf16>
    %86 = vector.shape_cast %85 : vector<1x16x16xbf16> to vector<16x16xbf16>
    %cst_31 = arith.constant dense<0.000000e+00> : vector<80x16xf32>
    %87 = tpu.matmul %84, %86, %cst_31 {dimension_numbers = #tpu.dot_dimension_numbers<[1], [0], [0], [1], [0, 0, 1, 1], [], []>} : vector<80x16xbf16>, vector<16x16xbf16>, vector<80x16xf32> -> vector<80x16xf32>
    %88 = vector.shape_cast %87 : vector<80x16xf32> to vector<5x16x16xf32>
    %89 = vector.extract_strided_slice %88 {offsets = [0, 0, 0], sizes = [1, 16, 16], strides = [1, 1, 1]} : vector<5x16x16xf32> to vector<1x16x16xf32>
    %90 = vector.extract_strided_slice %88 {offsets = [1, 0, 0], sizes = [1, 16, 16], strides = [1, 1, 1]} : vector<5x16x16xf32> to vector<1x16x16xf32>
    %91 = vector.extract_strided_slice %88 {offsets = [2, 0, 0], sizes = [1, 16, 16], strides = [1, 1, 1]} : vector<5x16x16xf32> to vector<1x16x16xf32>
    %92 = vector.extract_strided_slice %88 {offsets = [3, 0, 0], sizes = [1, 16, 16], strides = [1, 1, 1]} : vector<5x16x16xf32> to vector<1x16x16xf32>
    %93 = vector.extract_strided_slice %88 {offsets = [4, 0, 0], sizes = [1, 16, 16], strides = [1, 1, 1]} : vector<5x16x16xf32> to vector<1x16x16xf32>
    %94 = arith.mulf %89, %89 : vector<1x16x16xf32>
    %95 = arith.mulf %90, %90 : vector<1x16x16xf32>
    %96 = arith.mulf %89, %90 : vector<1x16x16xf32>
    %97 = arith.subf %91, %94 : vector<1x16x16xf32>
    %98 = arith.subf %92, %95 : vector<1x16x16xf32>
    %99 = arith.subf %93, %96 : vector<1x16x16xf32>
    %cst_32 = arith.constant 2.000000e+00 : f32
    %100 = vector.broadcast %cst_32 : f32 to vector<1x16x16xf32>
    %101 = arith.mulf %100, %99 : vector<1x16x16xf32>
    %cst_33 = arith.constant 8.99999984E-4 : f32
    %102 = vector.broadcast %cst_33 : f32 to vector<1x16x16xf32>
    %103 = arith.addf %101, %102 : vector<1x16x16xf32>
    %104 = arith.addf %97, %98 : vector<1x16x16xf32>
    %cst_34 = arith.constant 8.99999984E-4 : f32
    %105 = vector.broadcast %cst_34 : f32 to vector<1x16x16xf32>
    %106 = arith.addf %104, %105 : vector<1x16x16xf32>
    %107 = arith.divf %103, %106 : vector<1x16x16xf32>
    %108 = arith.mulf %107, %107 : vector<1x16x16xf32>
    %109 = arith.mulf %108, %107 : vector<1x16x16xf32>
    %110 = arith.mulf %77, %109 : vector<1x16x16xf32>
    %c3 = arith.constant 3 : index
    %c0_35 = arith.constant 0 : index
    %c0_36 = arith.constant 0 : index
    %111 = vector.load %arg2[%c3, %c0_35, %c0_36] : memref<5x16x16xbf16, #tpu.memory_space<vmem>>, vector<1x16x16xbf16>
    %112 = vector.shape_cast %111 : vector<1x16x16xbf16> to vector<16x16xbf16>
    %cst_37 = arith.constant dense<0.000000e+00> : vector<80x16xf32>
    %113 = tpu.matmul %11, %112, %cst_37 {dimension_numbers = #tpu.dot_dimension_numbers<[1], [0], [0], [1], [0, 0, 1, 1], [], []>} : vector<80x16xbf16>, vector<16x16xbf16>, vector<80x16xf32> -> vector<80x16xf32>
    %114 = vector.shape_cast %113 : vector<80x16xf32> to vector<5x16x16xf32>
    %115 = tpu.transpose %114, [0, 2, 1] : vector<5x16x16xf32> -> vector<5x16x16xf32>
    %116 = vector.shape_cast %115 : vector<5x16x16xf32> to vector<80x16xf32>
    %117 = arith.truncf %116 : vector<80x16xf32> to vector<80x16xbf16>
    %c3_38 = arith.constant 3 : index
    %c0_39 = arith.constant 0 : index
    %c0_40 = arith.constant 0 : index
    %118 = vector.load %arg1[%c3_38, %c0_39, %c0_40] : memref<5x16x16xbf16, #tpu.memory_space<vmem>>, vector<1x16x16xbf16>
    %119 = vector.shape_cast %118 : vector<1x16x16xbf16> to vector<16x16xbf16>
    %cst_41 = arith.constant dense<0.000000e+00> : vector<80x16xf32>
    %120 = tpu.matmul %117, %119, %cst_41 {dimension_numbers = #tpu.dot_dimension_numbers<[1], [0], [0], [1], [0, 0, 1, 1], [], []>} : vector<80x16xbf16>, vector<16x16xbf16>, vector<80x16xf32> -> vector<80x16xf32>
    %121 = vector.shape_cast %120 : vector<80x16xf32> to vector<5x16x16xf32>
    %122 = vector.extract_strided_slice %121 {offsets = [0, 0, 0], sizes = [1, 16, 16], strides = [1, 1, 1]} : vector<5x16x16xf32> to vector<1x16x16xf32>
    %123 = vector.extract_strided_slice %121 {offsets = [1, 0, 0], sizes = [1, 16, 16], strides = [1, 1, 1]} : vector<5x16x16xf32> to vector<1x16x16xf32>
    %124 = vector.extract_strided_slice %121 {offsets = [2, 0, 0], sizes = [1, 16, 16], strides = [1, 1, 1]} : vector<5x16x16xf32> to vector<1x16x16xf32>
    %125 = vector.extract_strided_slice %121 {offsets = [3, 0, 0], sizes = [1, 16, 16], strides = [1, 1, 1]} : vector<5x16x16xf32> to vector<1x16x16xf32>
    %126 = vector.extract_strided_slice %121 {offsets = [4, 0, 0], sizes = [1, 16, 16], strides = [1, 1, 1]} : vector<5x16x16xf32> to vector<1x16x16xf32>
    %127 = arith.mulf %122, %122 : vector<1x16x16xf32>
    %128 = arith.mulf %123, %123 : vector<1x16x16xf32>
    %129 = arith.mulf %122, %123 : vector<1x16x16xf32>
    %130 = arith.subf %124, %127 : vector<1x16x16xf32>
    %131 = arith.subf %125, %128 : vector<1x16x16xf32>
    %132 = arith.subf %126, %129 : vector<1x16x16xf32>
    %cst_42 = arith.constant 2.000000e+00 : f32
    %133 = vector.broadcast %cst_42 : f32 to vector<1x16x16xf32>
    %134 = arith.mulf %133, %132 : vector<1x16x16xf32>
    %cst_43 = arith.constant 8.99999984E-4 : f32
    %135 = vector.broadcast %cst_43 : f32 to vector<1x16x16xf32>
    %136 = arith.addf %134, %135 : vector<1x16x16xf32>
    %137 = arith.addf %130, %131 : vector<1x16x16xf32>
    %cst_44 = arith.constant 8.99999984E-4 : f32
    %138 = vector.broadcast %cst_44 : f32 to vector<1x16x16xf32>
    %139 = arith.addf %137, %138 : vector<1x16x16xf32>
    %140 = arith.divf %136, %139 : vector<1x16x16xf32>
    %141 = arith.mulf %140, %140 : vector<1x16x16xf32>
    %142 = arith.mulf %141, %140 : vector<1x16x16xf32>
    %143 = arith.mulf %110, %142 : vector<1x16x16xf32>
    %c4 = arith.constant 4 : index
    %c0_45 = arith.constant 0 : index
    %c0_46 = arith.constant 0 : index
    %144 = vector.load %arg2[%c4, %c0_45, %c0_46] : memref<5x16x16xbf16, #tpu.memory_space<vmem>>, vector<1x16x16xbf16>
    %145 = vector.shape_cast %144 : vector<1x16x16xbf16> to vector<16x16xbf16>
    %cst_47 = arith.constant dense<0.000000e+00> : vector<96x16xf32>
    %146 = tpu.matmul %12, %145, %cst_47 {dimension_numbers = #tpu.dot_dimension_numbers<[1], [0], [0], [1], [0, 0, 1, 1], [], []>} : vector<96x16xbf16>, vector<16x16xbf16>, vector<96x16xf32> -> vector<96x16xf32>
    %147 = vector.shape_cast %146 : vector<96x16xf32> to vector<6x16x16xf32>
    %148 = tpu.transpose %147, [0, 2, 1] : vector<6x16x16xf32> -> vector<6x16x16xf32>
    %149 = vector.shape_cast %148 : vector<6x16x16xf32> to vector<96x16xf32>
    %150 = arith.truncf %149 : vector<96x16xf32> to vector<96x16xbf16>
    %c4_48 = arith.constant 4 : index
    %c0_49 = arith.constant 0 : index
    %c0_50 = arith.constant 0 : index
    %151 = vector.load %arg1[%c4_48, %c0_49, %c0_50] : memref<5x16x16xbf16, #tpu.memory_space<vmem>>, vector<1x16x16xbf16>
    %152 = vector.shape_cast %151 : vector<1x16x16xbf16> to vector<16x16xbf16>
    %cst_51 = arith.constant dense<0.000000e+00> : vector<96x16xf32>
    %153 = tpu.matmul %150, %152, %cst_51 {dimension_numbers = #tpu.dot_dimension_numbers<[1], [0], [0], [1], [0, 0, 1, 1], [], []>} : vector<96x16xbf16>, vector<16x16xbf16>, vector<96x16xf32> -> vector<96x16xf32>
    %154 = vector.shape_cast %153 : vector<96x16xf32> to vector<6x16x16xf32>
    %155 = vector.extract_strided_slice %154 {offsets = [0, 0, 0], sizes = [1, 16, 16], strides = [1, 1, 1]} : vector<6x16x16xf32> to vector<1x16x16xf32>
    %156 = vector.extract_strided_slice %154 {offsets = [1, 0, 0], sizes = [1, 16, 16], strides = [1, 1, 1]} : vector<6x16x16xf32> to vector<1x16x16xf32>
    %157 = vector.extract_strided_slice %154 {offsets = [2, 0, 0], sizes = [1, 16, 16], strides = [1, 1, 1]} : vector<6x16x16xf32> to vector<1x16x16xf32>
    %158 = vector.extract_strided_slice %154 {offsets = [3, 0, 0], sizes = [1, 16, 16], strides = [1, 1, 1]} : vector<6x16x16xf32> to vector<1x16x16xf32>
    %159 = vector.extract_strided_slice %154 {offsets = [4, 0, 0], sizes = [1, 16, 16], strides = [1, 1, 1]} : vector<6x16x16xf32> to vector<1x16x16xf32>
    %160 = arith.mulf %155, %155 : vector<1x16x16xf32>
    %161 = arith.mulf %156, %156 : vector<1x16x16xf32>
    %162 = arith.mulf %155, %156 : vector<1x16x16xf32>
    %163 = arith.subf %157, %160 : vector<1x16x16xf32>
    %164 = arith.subf %158, %161 : vector<1x16x16xf32>
    %165 = arith.subf %159, %162 : vector<1x16x16xf32>
    %cst_52 = arith.constant 2.000000e+00 : f32
    %166 = vector.broadcast %cst_52 : f32 to vector<1x16x16xf32>
    %167 = arith.mulf %166, %165 : vector<1x16x16xf32>
    %cst_53 = arith.constant 8.99999984E-4 : f32
    %168 = vector.broadcast %cst_53 : f32 to vector<1x16x16xf32>
    %169 = arith.addf %167, %168 : vector<1x16x16xf32>
    %170 = arith.addf %163, %164 : vector<1x16x16xf32>
    %cst_54 = arith.constant 8.99999984E-4 : f32
    %171 = vector.broadcast %cst_54 : f32 to vector<1x16x16xf32>
    %172 = arith.addf %170, %171 : vector<1x16x16xf32>
    %173 = arith.divf %169, %172 : vector<1x16x16xf32>
    %174 = arith.mulf %173, %173 : vector<1x16x16xf32>
    %175 = arith.mulf %174, %173 : vector<1x16x16xf32>
    %176 = arith.mulf %143, %175 : vector<1x16x16xf32>
    %cst_55 = arith.constant 2.000000e+00 : f32
    %177 = vector.broadcast %cst_55 : f32 to vector<1x16x16xf32>
    %178 = arith.mulf %177, %162 : vector<1x16x16xf32>
    %cst_56 = arith.constant 9.99999974E-5 : f32
    %179 = vector.broadcast %cst_56 : f32 to vector<1x16x16xf32>
    %180 = arith.addf %178, %179 : vector<1x16x16xf32>
    %181 = arith.addf %160, %161 : vector<1x16x16xf32>
    %cst_57 = arith.constant 9.99999974E-5 : f32
    %182 = vector.broadcast %cst_57 : f32 to vector<1x16x16xf32>
    %183 = arith.addf %181, %182 : vector<1x16x16xf32>
    %184 = arith.divf %180, %183 : vector<1x16x16xf32>
    %185 = arith.mulf %184, %184 : vector<1x16x16xf32>
    %186 = arith.mulf %185, %184 : vector<1x16x16xf32>
    %187 = vector.extract_strided_slice %154 {offsets = [5, 0, 0], sizes = [1, 16, 16], strides = [1, 1, 1]} : vector<6x16x16xf32> to vector<1x16x16xf32>
    %188 = arith.mulf %186, %176 : vector<1x16x16xf32>
    %cst_58 = arith.constant 1.000000e+00 : f32
    %189 = vector.broadcast %cst_58 : f32 to vector<1x16x16xf32>
    %190 = arith.subf %189, %188 : vector<1x16x16xf32>
    %cst_59 = arith.constant 2.500000e-02 : f32
    %191 = vector.broadcast %cst_59 : f32 to vector<1x16x16xf32>
    %192 = arith.mulf %191, %190 : vector<1x16x16xf32>
    %cst_60 = arith.constant 9.750000e-01 : f32
    %193 = vector.broadcast %cst_60 : f32 to vector<1x16x16xf32>
    %194 = arith.mulf %193, %187 : vector<1x16x16xf32>
    %cst_61 = arith.constant 1.000000e+00 : f32
    %195 = vector.broadcast %cst_61 : f32 to vector<1x16x16xf32>
    %196 = arith.mulf %194, %195 : vector<1x16x16xf32>
    %197 = arith.addf %192, %196 : vector<1x16x16xf32>
    %cst_62 = arith.constant 2.000000e+02 : f32
    %198 = vector.broadcast %cst_62 : f32 to vector<1x16x16xf32>
    %199 = arith.mulf %198, %197 : vector<1x16x16xf32>
    %200 = vector.shape_cast %199 : vector<1x16x16xf32> to vector<1x1x16x16xf32>
    %cst_63 = arith.constant dense<0.000000e+00> : vector<1xf32>
    %201 = vector.multi_reduction <add>, %200, %cst_63 [1, 2, 3] : vector<1x1x16x16xf32> to vector<1xf32>
    %202 = vector.shape_cast %201 : vector<1xf32> to vector<1x1x1x1xf32>
    %203 = vector.extract %202[0, 0, 0, 0] : f32 from vector<1x1x1x1xf32>
    %204 = vector.broadcast %203 : f32 to vector<1x1x1xf32>
    %c0_64 = arith.constant 0 : index
    %c0_65 = arith.constant 0 : index
    %c0_66 = arith.constant 0 : index
    %205 = vector.load %arg5[%c0_64, %c0_65, %c0_66] : memref<1x1x1xf32, #tpu.memory_space<vmem>>, vector<1x1x1xf32>
    tpu.vector_store %arg5[%c0_64, %c0_65, %c0_66], %204 {strides = array<i32>} : memref<1x1x1xf32, #tpu.memory_space<vmem>>, vector<1x1x1xf32>,
    return
  }
  func.func @transform_0(%arg0: i32) -> (i32, i32, i32) {
    %c0_i32 = arith.constant 0 : i32
    %c0_i32_0 = arith.constant 0 : i32
    %c0_i32_1 = arith.constant 0 : i32
    %c0_i32_2 = arith.constant 0 : i32
    return %c0_i32, %c0_i32_0, %c0_i32_1 : i32, i32, i32
  }
  func.func @transform_1(%arg0: i32) -> (i32, i32, i32) {
    %c0_i32 = arith.constant 0 : i32
    %c0_i32_0 = arith.constant 0 : i32
    %c0_i32_1 = arith.constant 0 : i32
    %c0_i32_2 = arith.constant 0 : i32
    return %c0_i32, %c0_i32_0, %c0_i32_1 : i32, i32, i32
  }
  func.func @transform_2(%arg0: i32) -> (i32, i32, i32) {
    %c0_i32 = arith.constant 0 : i32
    %c0_i32_0 = arith.constant 0 : i32
    %c0_i32_1 = arith.constant 0 : i32
    return %arg0, %c0_i32, %c0_i32_0 : i32, i32, i32
  }
  func.func @transform_3(%arg0: i32) -> (i32, i32, i32) {
    %c0_i32 = arith.constant 0 : i32
    %c0_i32_0 = arith.constant 0 : i32
    %c0_i32_1 = arith.constant 0 : i32
    return %arg0, %c0_i32, %c0_i32_0 : i32, i32, i32
  }
  func.func @transform_4(%arg0: i32) -> (i32, i32, i32) {
    %c0_i32 = arith.constant 0 : i32
    %c0_i32_0 = arith.constant 0 : i32
    %c0_i32_1 = arith.constant 0 : i32
    return %arg0, %c0_i32, %c0_i32_0 : i32, i32, i32
  }
}

</mosaic_0001>

<bundles_post_ra>
// kernel: tpu_custom_call.1
= control target key start
LH: loop header
LB: loop body
LE: loop exit
PB: predicated region body
PF: predicated region fallthrough
CT: control target
= control target key end

     0   :  { %s3449_s0 = inlined_call_operand.hbm [shape: bf16[5,16,16], index: 0, kind: input, shape index: {}]   ;;  %s3450_s1 = inlined_call_operand.hbm [shape: bf16[5,16,16], index: 1, kind: input, shape index: {}]   ;;  %s3451_s2 = inlined_call_operand.hbm [shape: f32[2,16,16], index: 2, kind: input, shape index: {}]   ;;  %s3452_s3 = inlined_call_operand.hbm [shape: f32[2,16,16], index: 3, kind: input, shape index: {}]   ;;  %s3453_s4 = inlined_call_operand.vmem [shape: f32[2,1,1], index: 4, kind: output, shape index: {}]  }
   0x1   :  { %3463 = sst [smem:[#allocation12_spill]] %s3449_s0 }
   0x2   :  { %3464 = sst [smem:[#allocation13_spill]] %s3451_s2 }
   0x3   :  { %9 = vsyncpa [#allocation3], 0 }
   0x4   :  { %10 = vsyncpa [#allocation5], 0  ;;  %s3069_s15 = smov 0   ;;  %s3071_s16 = smov 0  }
   0x5   :  { %s3073_s17 = smov 0   ;;  %s3075_s18 = smov 0  }
   0x6 LB: > { %s3088_s19 = sadd.s32 4294967295, %s3032_s18   ;;  %s3091_s20 = sadd.s32 1, %s3032_s18   ;;  %s3032_s18 = sphi %s3075_s18, %s3491_s18   ;;  %s3028_s17 = sphi %s3073_s17, %s3490_s17   ;;  %s3024_s16 = sphi %s3071_s16, %s3489_s16   ;;  %s3020_s15 = sphi %s3069_s15, %s3488_s15  }
   0x7   : > { %s62_s21 = ssub.s32 %s3032_s18, %s3091_s20  ;;  %s65_s22 = sadd.s32 1, %s3028_s17 }
   0x8   : > { %p63_p0 = scmp.eq.s32.totalorder %s62_s21, 0  ;;  %p72_p1 = scmp.ne.s32.totalorder %s3028_s17, %s3024_s16 }
   0x9   : > { %p73_p2 = scmp.eq.s32.totalorder %s3032_s18, 0  ;;  %p78_p3 = scmp.ne.s32.totalorder %s3024_s16, %s3020_s15 }
   0xa   : > { %s3101_s23 = scalar_select %p63_p0, %s3028_s17, %s65_s22  }
   0xb   : > { %p3103_p4 = por %p73_p2, %p72_p1  ;;  %p3454_p5 = scmp.eq.s32.totalorder %s3088_s19, 0 }
   0xc   : > { %3465 = sst [smem:[#allocation11_spill]] %s3101_s23  ;;  %p2378_p6 = scmp.ge.s32.totalorder %s3032_s18, 1 }
   0xd   : > { %p141_p7 = scmp.lt.s32.totalorder %s3032_s18, 3  ;;  %p3112_p8 = por %p3454_p5, %p78_p3 }
   0xe   : > { %s3034_s27 = smov [#allocation2]   ;;  %p2755_p12 = scmp.lt.s32.totalorder %s3032_s18, 2 }
   0xf   : > { %s3467_s25 = scalar_select %p3112_p8, 1, 0 }
  0x10   : > { %p3116_p9 = pnand %p2378_p6, %p141_p7  ;;  %s153_s28 = sshll.u32 %s3034_s27, 4  ;;  %s154_s28 = int_to_ptr.vmem [resolvable:$true] %s153_s28 }
  0x11   : > { %s180_s30 = sand.u32 1, %s3032_s18   ;;  %s182_s5 = sand.u32 1, %s3028_s17  }
  0x12   : > { %s3468_s26 = scalar_select %p3116_p9, 1, 0 }
  0x13   : > { %p2739_p10 = pneg %p3116_p9  ;;  %p3133_p13 = pnand %p2755_p12, %p3103_p4 }
  0x14   : > { %s3471_s0 = sld [smem:[#allocation12_spill]] }
  0x15   : > { %p3124_p11 = pnand %p2739_p10, %p3454_p5 }
  0x16   : > { %s3470_s6 = scalar_select %p3133_p13, 1, 0 }
  0x17   : > { %p3458_p1 = pneg %p3124_p11 }
  0x1a   : > { %s2874_s9 = scalar_lea.hbm %s3471_s0, 640 }
  0x1b   : > { %p2875_p0 = scmp.ne.s32.totalorder %s3471_s0, %s2874_s9  ;;  %p2881_p4 = scmp.lt.u32.totalorder %s2874_s9, %s3471_s0 }
  0x1d   : > { %p2877_p2 = pnand %p3458_p1, %p2875_p0 }
  0x1f   : > { %p2878_p3 = pneg %p2877_p2 }
  0x21   : > { %p2883_p6 = pnand %p2881_p4, %p2878_p3 }
  0x23   : > { %2886 = shalt.err (!%p2883_p6)
}
  0x24   : > { %s2887_s14 = scalar_lea.vmem %s154_s28, 640  ;;  %p2895_p5 = scmp.lt.s32.totalorder %s154_s28, %s154_s28 }
  0x25   : > { %p2888_p7 = scmp.ne.s32.totalorder %s154_s28, %s2887_s14  ;;  %p2896_p8 = scmp.lt.s32.totalorder %s2887_s14, %s2887_s14 }
  0x27   : > { %p2890_p10 = pnand %p2888_p7, %p3458_p1  ;;  %p2897_p9 = por %p2896_p8, %p2895_p5 }
  0x29   : > { %p2891_p12 = pneg %p2890_p10 }
  0x2b   : > { %p2898_p13 = pnand %p2897_p9, %p2891_p12 }
  0x2d   : > { %2901 = shalt.err (!%p2898_p13)
}
  0x2e   : > { %s3459_s15 = smov 64   ;;  %s3460_s21 = smov 4  }
  0x2f   : > { %2742 = dma.hbm_to_vmem [thread:$0]  (!%p3124_p11), %s3471_s0, 640, %s154_s28, [#allocation3], %s3459_s15, %s3459_s15, %s3460_s21  }
  0x30   : > { %s3162_s27 = sshll.u32 %s182_s5, 4  ;;  %s2457_s7 = sshll.u32 %s3032_s18, 8 }
  0x31   : > { %s3472_s2 = sld [smem:[#allocation13_spill]]  ;;  %s184_s11 = scalar_lea.vmem [#allocation6], %s3162_s27 }
  0x32   : > { %s191_s12 = sshll.u32 %s184_s11, 4  ;;  %s3175_s13 = scalar_lea.sflag [#allocation3], %s180_s30  ;;  %s3173_s12 = int_to_ptr.vmem [resolvable:$true] %s191_s12 }
  0x33   : > { %p3473_p8 = scmp.ne.s32.totalorder %s3470_s6, 0 }
  0x35   : > { %p3461_p9 = pneg %p3473_p8 }
  0x37   : > { %s3170_s10 = scalar_lea.hbm %s3472_s2, %s2457_s7  ;;  %s2907_s22 = scalar_lea.hbm %s3472_s2, 512 }
  0x38   : > { %s2902_s28 = scalar_lea.hbm %s3170_s10, 256  ;;  %p2908_p2 = scmp.lt.u32.totalorder %s3170_s10, %s3472_s2 }
  0x39   : > { %p2903_p5 = scmp.ne.s32.totalorder %s3170_s10, %s2902_s28  ;;  %p2909_p3 = scmp.lt.u32.totalorder %s2907_s22, %s2902_s28 }
  0x3a   : > { %p2911_p6 = scmp.lt.u32.totalorder %s2902_s28, %s3170_s10 }
  0x3b   : > { %p2905_p13 = pnand %p3461_p9, %p2903_p5  ;;  %p2910_p4 = por %p2909_p3, %p2908_p2 }
  0x3d   : > { %p2906_p0 = pneg %p2905_p13  ;;  %p2912_p7 = por %p2911_p6, %p2910_p4 }
  0x3f   : > { %p2913_p10 = pnand %p2912_p7, %p2906_p0 }
  0x41   : > { %2916 = shalt.err (!%p2913_p10)
}
  0x42   : > { %s2917_s30 = scalar_lea.vmem %s3173_s12, 256  ;;  %s3037_s9 = smov [#allocation6]  }
  0x43   : > { %p2918_p12 = scmp.ne.s32.totalorder %s3173_s12, %s2917_s30  ;;  %s2922_s11 = sshll.u32 %s3037_s9, 4  ;;  %s2923_s11 = int_to_ptr.vmem [resolvable:$false] %s2922_s11 }
  0x44   : > { %s2924_s5 = scalar_lea.vmem %s2923_s11, 512  ;;  %p2925_p1 = scmp.lt.s32.totalorder %s3173_s12, %s2923_s11 }
  0x45   : > { %p2920_p5 = pnand %p2918_p12, %p3461_p9  ;;  %p2926_p2 = scmp.lt.s32.totalorder %s2924_s5, %s2917_s30 }
  0x47   : > { %p2921_p13 = pneg %p2920_p5  ;;  %p2927_p3 = por %p2926_p2, %p2925_p1 }
  0x49   : > { %p2928_p4 = pnand %p2927_p3, %p2921_p13 }
  0x4b   : > { %2931 = shalt.err (!%p2928_p4)
}
  0x4c   : > { %s3038_s28 = smov 128   ;;  %s3039_s14 = smov 8  }
  0x4d   : > { %2749 = dma.hbm_to_vmem [thread:$0]  (!%p3473_p8), %s3170_s10, 256, %s3173_s12, %s3175_s13, %s3038_s28, %s3038_s28, %s3039_s14  }
  0x4e   : > { %s3040_s22 = smov [#allocation4]   ;;  %s3211_s9 = scalar_lea.hbm %s3452_s3, %s2457_s7 }
  0x4f   : > { %s166_s24 = sshll.u32 %s3040_s22, 4  ;;  %s205_s11 = scalar_lea.vmem [#allocation7], %s3162_s27  ;;  %s167_s24 = int_to_ptr.vmem [resolvable:$true] %s166_s24 }
  0x50   : > { %s212_s5 = sshll.u32 %s205_s11, 4  ;;  %s2932_s0 = scalar_lea.hbm %s3450_s1, 640  ;;  %s3237_s5 = int_to_ptr.vmem [resolvable:$true] %s212_s5 }
  0x51   : > { %p2933_p1 = scmp.ne.s32.totalorder %s3450_s1, %s2932_s0  ;;  %p3474_p0 = pneg %p3124_p11 }
  0x52   : > { %p2939_p10 = scmp.lt.u32.totalorder %s2932_s0, %s3450_s1 }
  0x53   : > { %p2935_p6 = pnand %p2933_p1, %p3474_p0 }
  0x55   : > { %p2936_p7 = pneg %p2935_p6 }
  0x57   : > { %p2941_p12 = pnand %p2939_p10, %p2936_p7 }
  0x59   : > { %2944 = shalt.err (!%p2941_p12)
}
  0x5a   : > { %s2945_s27 = scalar_lea.vmem %s167_s24, 640  ;;  %p3475_p13 = pmov %p3474_p0 }
  0x5b   : > { %p2946_p5 = scmp.ne.s32.totalorder %s167_s24, %s2945_s27  ;;  %p2953_p4 = scmp.lt.s32.totalorder %s167_s24, %s167_s24 }
  0x5c   : > { %p2954_p9 = scmp.lt.s32.totalorder %s2945_s27, %s2945_s27 }
  0x5d   : > { %p2948_p2 = pnand %p2946_p5, %p3475_p13 }
  0x5e   : > { %p2955_p8 = por %p2954_p9, %p2953_p4 }
  0x5f   : > { %p2949_p3 = pneg %p2948_p2 }
  0x61   : > { %p2956_p0 = pnand %p2955_p8, %p2949_p3 }
  0x63   : > { %2959 = shalt.err (!%p2956_p0)
}
  0x64   : > { %s3476_s2 = smov 4   ;;  %s3477_s23 = smov 64  }
  0x65   : > { %2745 = dma.hbm_to_vmem [thread:$0]  (!%p3124_p11), %s3450_s1, 640, %s167_s24, [#allocation5], %s3477_s23, %s3477_s23, %s3476_s2  }
  0x66   : > { %s2960_s21 = scalar_lea.hbm %s3211_s9, 256  ;;  %p3478_p8 = scmp.ne.s32.totalorder %s3470_s6, 0 }
  0x67   : > { %p2961_p9 = scmp.ne.s32.totalorder %s3211_s9, %s2960_s21  ;;  %s2965_s12 = scalar_lea.hbm %s3452_s3, 512 }
  0x68   : > { %p3479_p1 = pneg %p3478_p8  ;;  %p2966_p10 = scmp.lt.u32.totalorder %s3211_s9, %s3452_s3 }
  0x69   : > { %p2967_p12 = scmp.lt.u32.totalorder %s2965_s12, %s2960_s21  ;;  %p2969_p13 = scmp.lt.u32.totalorder %s2960_s21, %s3211_s9 }
  0x6a   : > { %p2963_p6 = pnand %p2961_p9, %p3479_p1 }
  0x6b   : > { %p2968_p5 = por %p2967_p12, %p2966_p10 }
  0x6c   : > { %p2964_p7 = pneg %p2963_p6 }
  0x6d   : > { %p2970_p11 = por %p2969_p13, %p2968_p5 }
  0x6f   : > { %p2971_p2 = pnand %p2970_p11, %p2964_p7 }
  0x71   : > { %2974 = shalt.err (!%p2971_p2)
}
  0x72   : > { %s2975_s24 = scalar_lea.vmem %s3237_s5, 256  ;;  %p3480_p4 = pmov %p3479_p1 }
  0x73   : > { %p2976_p3 = scmp.ne.s32.totalorder %s3237_s5, %s2975_s24  ;;  %s3041_s30 = smov [#allocation7]  }
  0x74   : > { %s2980_s11 = sshll.u32 %s3041_s30, 4  ;;  %s2981_s11 = int_to_ptr.vmem [resolvable:$false] %s2980_s11 }
  0x75   : > { %p2978_p0 = pnand %p2976_p3, %p3480_p4  ;;  %s2982_s18 = scalar_lea.vmem %s2981_s11, 512 }
  0x76   : > { %p2983_p1 = scmp.lt.s32.totalorder %s3237_s5, %s2981_s11  ;;  %p2984_p6 = scmp.lt.s32.totalorder %s2982_s18, %s2975_s24 }
  0x77   : > { %p2979_p9 = pneg %p2978_p0 }
  0x78   : > { %p2985_p10 = por %p2984_p6, %p2983_p1 }
  0x7a   : > { %p2986_p12 = pnand %p2985_p10, %p2979_p9 }
  0x7c   : > { %2989 = shalt.err (!%p2986_p12)
}
  0x7d   : > { %2752 = dma.hbm_to_vmem [thread:$0]  (!%p3478_p8), %s3211_s9, 256, %s3237_s5, %s3175_s13, %s3038_s28, %s3038_s28, %s3039_s14  }
  0x7e   : > { %p3481_p7 = scmp.ne.s32.totalorder %s3468_s26, 0 }
  0x7f   : > { %p3482_p5 = scmp.eq.s32.totalorder (!%p3481_p7), %s3088_s19, 0 }
  0x80   : > { %224 = sbr.rel (%p3481_p7) target bundleno = 1130 (0x46a), region = 36 }
  0x87   : > { %3007 = dma.done.wait (%p3482_p5), [#allocation3], 640   ;;  %p3483_p13 = pmov %p3482_p5 }
  0x88   : > { %p3484_p11 = pmov %p3482_p5 }
  0x89   : > { %3009 = vsyncadd (%p3483_p13), [#allocation3], 4294966656 }
  0x8a   : > { %3011 = dma.done.wait (%p3484_p11), [#allocation5], 640   ;;  %p3485_p2 = pmov %p3482_p5 }
  0x8b   : > { %s234_s6 = sand.u32 1, %s3088_s19   ;;  %s236_s13 = sand.u32 1, %s3024_s16  }
  0x8c   : > { %3013 = vsyncadd (%p3485_p2), [#allocation5], 4294966656  ;;  %s2391_s28 = sshll.u32 %s236_s13, 4  ;;  %s235_s26 = scalar_lea.sflag [#allocation3], %s234_s6 }
  0x8d   : > { %s238_s14 = scalar_lea.vmem [#allocation6], %s2391_s28  ;;  %p3486_p8 = scmp.ne.s32.totalorder %s3467_s25, 0 }
  0x8f   : > { %3015 = dma.done.wait (%p3486_p8), %s235_s26, 512  }
  0x90   : > { %3017 = vsyncadd (%p3486_p8), %s235_s26, 4294966784  ;;  %v3042_v0 = vmov 0.0   ;;  %vm3043_vm0 = vmmov 0   ;;  %v2840_v1 = vld [vmem:[#allocation4] sm:$0xff]   ;;  %v279_v2 = vld [vmem:[%s238_s14] sm:$0xff]  ;;  %vm307_vm1 = vcmask 130048  }
  0x91   : > { %2521 = vmatprep.subr.bf16.mxu0 %v3042_v0  ;;  %2523 = vmatprep.mubr.msk.bf16.mxu0 %vm3043_vm0, %v3042_v0  ;;  %v280_v3 = vld [vmem:[%s238_s14 + $0x8] sm:$0xff]  ;;  %v2841_v5 = vld [vmem:[#allocation4 + $0x8] sm:$0xff]   ;;  %s247_s25 = scalar_lea.vmem [#allocation7], %s2391_s28  ;;  %v283_v9 = vmul.f32 %v279_v2, %v279_v2  ;;  %v2843_v24 = vld [vmem:[#allocation4 + $0x18] sm:$0xff]   ;;  %p275_p3 = scmp.lt.s32.totalorder %s3088_s19, 1  ;;  %vm2277_vm2 = vcmask 0  }
  0x92   : > { %2543 = vmatprep.subr.bf16.mxu1 %v3042_v0  ;;  %2545 = vmatprep.mubr.msk.bf16.mxu1 %vm3043_vm0, %v3042_v0  ;;  %v3288_v4 = vpack.c.bf16 %v280_v3, %v279_v2  ;;  %v281_v6 = vld [vmem:[%s247_s25] sm:$0xff]  ;;  %v282_v7 = vld [vmem:[%s247_s25 + $0x8] sm:$0xff]  ;;  %v284_v10 = vmul.f32 %v280_v3, %v280_v3 }
  0x93   : > { %2522 = vmatpush3.bf16.msra.mxu0 %v2840_v1  ;;  %v294_v8 = vpack.c.bf16 %v282_v7, %v281_v6  ;;  %v285_v12 = vmul.f32 %v281_v6, %v281_v6  ;;  %v286_v13 = vmul.f32 %v282_v7, %v282_v7  ;;  %v287_v15 = vmul.f32 %v281_v6, %v279_v2  ;;  %v2842_v18 = vld [vmem:[#allocation4 + $0x10] sm:$0xff]   ;;  %v2844_v25 = vld [vmem:[#allocation4 + $0x20] sm:$0xff]   ;;  %v2845_v30 = vld [vmem:[#allocation2] sm:$0xff]   ;;  %s3493_s19 = smov (!%p275_p3, %s3088_s19), 1 }
  0x94   : > { %2565 = vmatprep.subr.bf16.mxu0 %v3042_v0  ;;  %v295_v11 = vpack.c.bf16 %v284_v10, %v283_v9  ;;  %v288_v16 = vmul.f32 %v282_v7, %v280_v3  ;;  %v289_v19 = vsub.f32 %v279_v2, %v281_v6  ;;  %v290_v20 = vsub.f32 %v280_v3, %v282_v7  ;;  %s277_s10 = scalar_lea.vmem %s3453_s4, %s3493_s19 }
  0x95   : > { %v296_v14 = vpack.c.bf16 %v286_v13, %v285_v12  ;;  %2544 = vmatpush3.bf16.msra.mxu1 %v2845_v30 }
  0x96   : > { %2524 = vmatmul.mubr.msk.bf16.vlgmr.msra.gmra.mrb[0].mxu0 %vm307_vm1, %v3288_v4  ;;  %v297_v17 = vpack.c.bf16 %v288_v16, %v287_v15  ;;  %v291_v21 = vand.u32 2147483647, %v289_v19  ;;  %v292_v22 = vand.u32 2147483647, %v290_v20  ;;  %2587 = vmatprep.subr.bf16.mxu1 %v3042_v0 }
  0x97   : > { %2566 = vmatpush3.bf16.msra.mxu0 %v2841_v5  ;;  %2527 = vmatprep.mubr.msk.bf16.mxu0 %vm3043_vm0, %v3042_v0 }
  0x98   : > { %2609 = vmatprep.subr.bf16.mxu0 %v3042_v0  ;;  %v298_v23 = vpack.c.bf16 %v292_v22, %v291_v21 }
  0x9e   : > { %2528 = vmatmul.mubr.msk.bf16.gmra.mrb[4].mxu0 %vm307_vm1, %v294_v8 }
  0x9f   : > { %2531 = vmatprep.mubr.msk.bf16.mxu0 %vm3043_vm0, %v3042_v0 }
  0xa6   : > { %2532 = vmatmul.mubr.msk.bf16.gmra.mrb[8].mxu0 %vm307_vm1, %v295_v11 }
  0xa7   : > { %2535 = vmatprep.mubr.msk.bf16.mxu0 %vm3043_vm0, %v3042_v0 }
  0xae   : > { %2536 = vmatmul.mubr.msk.bf16.gmra.mrb[12].mxu0 %vm307_vm1, %v296_v14 }
  0xaf   : > { %2539 = vmatprep.mubr.msk.bf16.mxu0 %vm3043_vm0, %v3042_v0 }
  0xb6   : > { %2540 = vmatmul.mubr.msk.bf16.gmra.mrb[16].mxu0 %vm307_vm1, %v297_v17 }
  0xb7   : > { %2567 = vmatprep.mubr.msk.bf16.mxu0 %vm3043_vm0, %v3042_v0 }
  0xbe   : > { %2568 = vmatmul.mubr.msk.bf16.vlgmr.msra.gmra.mrb[20].mxu0 %vm307_vm1, %v3288_v4 }
  0xbf   : > { %2610 = vmatpush3.bf16.msra.mxu0 %v2842_v18  ;;  %2571 = vmatprep.mubr.msk.bf16.mxu0 %vm3043_vm0, %v3042_v0 }
  0xc0   : > { %2653 = vmatprep.subr.bf16.mxu0 %v3042_v0 }
  0xc6   : > { %2572 = vmatmul.mubr.msk.bf16.gmra.mrb[24].mxu0 %vm307_vm1, %v294_v8 }
  0xc7   : > { %2575 = vmatprep.mubr.msk.bf16.mxu0 %vm3043_vm0, %v3042_v0 }
  0xce   : > { %2576 = vmatmul.mubr.msk.bf16.gmra.mrb[28].mxu0 %vm307_vm1, %v295_v11 }
  0xcf   : > { %2579 = vmatprep.mubr.msk.bf16.mxu0 %vm3043_vm0, %v3042_v0 }
  0xd6   : > { %2580 = vmatmul.mubr.msk.bf16.gmra.mrb[32].mxu0 %vm307_vm1, %v296_v14 }
  0xd7   : > { %2583 = vmatprep.mubr.msk.bf16.mxu0 %vm3043_vm0, %v3042_v0 }
  0xde   : > { %2584 = vmatmul.mubr.msk.bf16.gmra.mrb[36].mxu0 %vm307_vm1, %v297_v17 }
  0xdf   : > { %2611 = vmatprep.mubr.msk.bf16.mxu0 %vm3043_vm0, %v3042_v0 }
  0xe6   : > { %2612 = vmatmul.mubr.msk.bf16.vlgmr.msra.gmra.mrb[40].mxu0 %vm307_vm1, %v3288_v4 }
  0xe7   : > { %2654 = vmatpush3.bf16.msra.mxu0 %v2843_v24  ;;  %2615 = vmatprep.mubr.msk.bf16.mxu0 %vm3043_vm0, %v3042_v0 }
  0xe8   : > { %2697 = vmatprep.subr.bf16.mxu0 %v2844_v25 }
  0xee   : > { %2616 = vmatmul.mubr.msk.bf16.gmra.mrb[44].mxu0 %vm307_vm1, %v294_v8 }
  0xef   : > { %2619 = vmatprep.mubr.msk.bf16.mxu0 %vm3043_vm0, %v3042_v0 }
  0xf6   : > { %2620 = vmatmul.mubr.msk.bf16.gmra.mrb[48].mxu0 %vm307_vm1, %v295_v11 }
  0xf7   : > { %2623 = vmatprep.mubr.msk.bf16.mxu0 %vm3043_vm0, %v3042_v0 }
  0xfe   : > { %2624 = vmatmul.mubr.msk.bf16.gmra.mrb[52].mxu0 %vm307_vm1, %v296_v14 }
  0xff   : > { %2627 = vmatprep.mubr.msk.bf16.mxu0 %vm3043_vm0, %v3042_v0 }
 0x106   : > { %2628 = vmatmul.mubr.msk.bf16.gmra.mrb[56].mxu0 %vm307_vm1, %v297_v17 }
 0x107   : > { %2655 = vmatprep.mubr.msk.bf16.mxu0 %vm3043_vm0, %v3042_v0 }
 0x10e   : > { %2656 = vmatmul.mubr.msk.bf16.vlgmr.msra.gmra.mrb[60].mxu0 %vm307_vm1, %v3288_v4 }
 0x10f   : > { %2698 = vmatpush3.bf16.msra.mxu0 %v2844_v25  ;;  %2659 = vmatprep.mubr.msk.bf16.mxu0 %vm3043_vm0, %v3042_v0 }
 0x116   : > { %2660 = vmatmul.mubr.msk.bf16.gmra.mrb[64].mxu0 %vm307_vm1, %v294_v8 }
 0x117   : > { %2663 = vmatprep.mubr.msk.bf16.mxu0 %vm3043_vm0, %v3042_v0 }
 0x11e   : > { %2664 = vmatmul.mubr.msk.bf16.gmra.mrb[68].mxu0 %vm307_vm1, %v295_v11 }
 0x11f   : > { %2667 = vmatprep.mubr.msk.bf16.mxu0 %vm3043_vm0, %v3042_v0 }
 0x126   : > { %2668 = vmatmul.mubr.msk.bf16.gmra.mrb[72].mxu0 %vm307_vm1, %v296_v14 }
 0x127   : > { %2671 = vmatprep.mubr.msk.bf16.mxu0 %vm3043_vm0, %v3042_v0 }
 0x12e   : > { %2672 = vmatmul.mubr.msk.bf16.gmra.mrb[76].mxu0 %vm307_vm1, %v297_v17 }
 0x12f   : > { %2699 = vmatprep.mubr.msk.bf16.mxu0 %vm307_vm1, %v3288_v4 }
 0x136   : > { %2700 = vmatmul.mubr.msk.bf16.vlgmr.msra.gmra.mrb[80].mxu0 %vm307_vm1, %v294_v8 }
 0x137   : > { %2703 = vmatprep.mubr.msk.bf16.mxu0 %vm307_vm1, %v295_v11 }
 0x13e   : > { %2704 = vmatmul.mubr.msk.bf16.gmra.mrb[84].mxu0 %vm307_vm1, %v296_v14 }
 0x13f   : > { %2707 = vmatprep.mubr.msk.bf16.mxu0 %vm307_vm1, %v297_v17 }
 0x146   : > { %2708 = vmatmul.mubr.msk.bf16.gmra.mrb[88].mxu0 %vm307_vm1, %v298_v23 }
 0x169   : > { %v357_v26 = vpop.f32.mrb[0].mxu0 }
 0x16a   : > { %396 = vxpose.xlu0.b32.start [1/2] (short) (narrow) %v357_v26, 16  ;;  %v2525_v27 = vpop.f32.mrb[1].mxu0 }
 0x16b   : > { %v360_v28 = vpop.f32.mrb[2].mxu0 }
 0x16c   : > { %v2526_v29 = vpop.f32.mrb[3].mxu0 }
 0x16e   : > { %397 = vxpose.xlu0.b32.end [2/2] (short) (narrow) %v360_v28, 16 }
 0x171   : > { %v365_v31 = vpop.f32.mrb[4].mxu0 }
 0x172   : > { %428 = vxpose.xlu1.b32.start [1/2] (short) (narrow) %v365_v31, 16  ;;  %v2529_v32 = vpop.f32.mrb[5].mxu0 }
 0x173   : > { %v368_v33 = vpop.f32.mrb[6].mxu0 }
 0x174   : > { %v2530_v34 = vpop.f32.mrb[7].mxu0 }
 0x176   : > { %429 = vxpose.xlu1.b32.end [2/2] (short) (narrow) %v368_v33, 16 }
 0x179   : > { %v373_v35 = vpop.f32.mrb[8].mxu0 }
 0x17a   : > { %460 = vxpose.xlu0.b32.start [1/2] (short) (narrow) %v373_v35, 16  ;;  %v2533_v36 = vpop.f32.mrb[9].mxu0  ;;  %v2846_v35 = vld [vmem:[#allocation2 + $0x8] sm:$0xff]  }
 0x17b   : > { %v376_v37 = vpop.f32.mrb[10].mxu0 }
 0x17c   : > { %v2534_v38 = vpop.f32.mrb[11].mxu0 }
 0x17e   : > { %461 = vxpose.xlu0.b32.end [2/2] (short) (narrow) %v376_v37, 16 }
 0x181   : > { %v381_v39 = vpop.f32.mrb[12].mxu0 }
 0x182   : > { %492 = vxpose.xlu1.b32.start [1/2] (short) (narrow) %v381_v39, 16  ;;  %v2537_v40 = vpop.f32.mrb[13].mxu0 }
 0x183   : > { %v384_v41 = vpop.f32.mrb[14].mxu0 }
 0x184   : > { %v2538_v42 = vpop.f32.mrb[15].mxu0 }
 0x186   : > { %493 = vxpose.xlu1.b32.end [2/2] (short) (narrow) %v384_v41, 16 }
 0x189   : > { %v389_v43 = vpop.f32.mrb[16].mxu0 }
 0x18a   : > { %524 = vxpose.xlu0.b32.start [1/2] (short) (narrow) %v389_v43, 16  ;;  %v2541_v44 = vpop.f32.mrb[17].mxu0 }
 0x18b   : > { %v392_v45 = vpop.f32.mrb[18].mxu0 }
 0x18c   : > { %v2542_v46 = vpop.f32.mrb[19].mxu0 }
 0x18e   : > { %525 = vxpose.xlu0.b32.end [2/2] (short) (narrow) %v392_v45, 16 }
 0x191   : > { %v728_v47 = vpop.f32.mrb[20].mxu0 }
 0x192   : > { %767 = vxpose.xlu1.b32.start [1/2] (short) (narrow) %v728_v47, 16  ;;  %v2569_v48 = vpop.f32.mrb[21].mxu0 }
 0x193   : > { %v731_v49 = vpop.f32.mrb[22].mxu0 }
 0x194   : > { %v2570_v50 = vpop.f32.mrb[23].mxu0 }
 0x196   : > { %768 = vxpose.xlu1.b32.end [2/2] (short) (narrow) %v731_v49, 16 }
 0x199   : > { %v736_v51 = vpop.f32.mrb[24].mxu0 }
 0x19a   : > { %799 = vxpose.xlu0.b32.start [1/2] (short) (narrow) %v736_v51, 16  ;;  %v2573_v52 = vpop.f32.mrb[25].mxu0 }
 0x19b   : > { %v739_v53 = vpop.f32.mrb[26].mxu0 }
 0x19c   : > { %v2574_v54 = vpop.f32.mrb[27].mxu0 }
 0x19e   : > { %800 = vxpose.xlu0.b32.end [2/2] (short) (narrow) %v739_v53, 16 }
 0x1a1   : > { %v744_v55 = vpop.f32.mrb[28].mxu0 }
 0x1a2   : > { %831 = vxpose.xlu1.b32.start [1/2] (short) (narrow) %v744_v55, 16  ;;  %v2577_v56 = vpop.f32.mrb[29].mxu0 }
 0x1a3   : > { %v747_v57 = vpop.f32.mrb[30].mxu0 }
 0x1a4   : > { %v2578_v58 = vpop.f32.mrb[31].mxu0 }
 0x1a6   : > { %832 = vxpose.xlu1.b32.end [2/2] (short) (narrow) %v747_v57, 16 }
 0x1a9   : > { %v752_v59 = vpop.f32.mrb[32].mxu0 }
 0x1aa   : > { %863 = vxpose.xlu0.b32.start [1/2] (short) (narrow) %v752_v59, 16  ;;  %v2581_v60 = vpop.f32.mrb[33].mxu0 }
 0x1ab   : > { %v755_v61 = vpop.f32.mrb[34].mxu0 }
 0x1ac   : > { %v2582_v62 = vpop.f32.mrb[35].mxu0 }
 0x1ae   : > { %864 = vxpose.xlu0.b32.end [2/2] (short) (narrow) %v755_v61, 16 }
 0x1b1   : > { %v760_v63 = vpop.f32.mrb[36].mxu0 }
 0x1b2   : > { %895 = vxpose.xlu1.b32.start [1/2] (short) (narrow) %v760_v63, 16  ;;  %v2585_v1 = vpop.f32.mrb[37].mxu0 }
 0x1b3   : > { %v763_v2 = vpop.f32.mrb[38].mxu0 }
 0x1b4   : > { %v2586_v3 = vpop.f32.mrb[39].mxu0 }
 0x1b6   : > { %896 = vxpose.xlu1.b32.end [2/2] (short) (narrow) %v763_v2, 16 }
 0x1b9   : > { %v1102_v4 = vpop.f32.mrb[40].mxu0 }
 0x1ba   : > { %1141 = vxpose.xlu0.b32.start [1/2] (short) (narrow) %v1102_v4, 16  ;;  %v2613_v5 = vpop.f32.mrb[41].mxu0 }
 0x1bb   : > { %v1105_v6 = vpop.f32.mrb[42].mxu0 }
 0x1bc   : > { %v2614_v7 = vpop.f32.mrb[43].mxu0 }
 0x1be   : > { %1142 = vxpose.xlu0.b32.end [2/2] (short) (narrow) %v1105_v6, 16 }
 0x1c1   : > { %v1110_v8 = vpop.f32.mrb[44].mxu0 }
 0x1c2   : > { %1173 = vxpose.xlu1.b32.start [1/2] (short) (narrow) %v1110_v8, 16  ;;  %v2617_v9 = vpop.f32.mrb[45].mxu0 }
 0x1c3   : > { %v1113_v10 = vpop.f32.mrb[46].mxu0 }
 0x1c4   : > { %v2618_v11 = vpop.f32.mrb[47].mxu0 }
 0x1c5   : > { %v2847_v11 = vld [vmem:[#allocation2 + $0x10] sm:$0xff]  }
 0x1c6   : > { %1174 = vxpose.xlu1.b32.end [2/2] (short) (narrow) %v1113_v10, 16 }
 0x1c9   : > { %v1118_v12 = vpop.f32.mrb[48].mxu0 }
 0x1ca   : > { %1205 = vxpose.xlu0.b32.start [1/2] (short) (narrow) %v1118_v12, 16  ;;  %v2621_v13 = vpop.f32.mrb[49].mxu0 }
 0x1cb   : > { %v1121_v14 = vpop.f32.mrb[50].mxu0 }
 0x1cc   : > { %v2622_v15 = vpop.f32.mrb[51].mxu0 }
 0x1ce   : > { %1206 = vxpose.xlu0.b32.end [2/2] (short) (narrow) %v1121_v14, 16 }
 0x1d1   : > { %v1126_v16 = vpop.f32.mrb[52].mxu0 }
 0x1d2   : > { %1237 = vxpose.xlu1.b32.start [1/2] (short) (narrow) %v1126_v16, 16  ;;  %v2625_v17 = vpop.f32.mrb[53].mxu0 }
 0x1d3   : > { %v1129_v18 = vpop.f32.mrb[54].mxu0 }
 0x1d4   : > { %v2626_v19 = vpop.f32.mrb[55].mxu0 }
 0x1d6   : > { %1238 = vxpose.xlu1.b32.end [2/2] (short) (narrow) %v1129_v18, 16 }
 0x1d9   : > { %v1134_v20 = vpop.f32.mrb[56].mxu0 }
 0x1da   : > { %1269 = vxpose.xlu0.b32.start [1/2] (short) (narrow) %v1134_v20, 16  ;;  %v2629_v21 = vpop.f32.mrb[57].mxu0 }
 0x1db   : > { %v1137_v22 = vpop.f32.mrb[58].mxu0 }
 0x1dc   : > { %v2630_v23 = vpop.f32.mrb[59].mxu0 }
 0x1de   : > { %1270 = vxpose.xlu0.b32.end [2/2] (short) (narrow) %v1137_v22, 16 }
 0x1e1   : > { %v1476_v24 = vpop.f32.mrb[60].mxu0 }
 0x1e2   : > { %1515 = vxpose.xlu1.b32.start [1/2] (short) (narrow) %v1476_v24, 16  ;;  %v2657_v25 = vpop.f32.mrb[61].mxu0 }
 0x1e3   : > { %v1479_v26 = vpop.f32.mrb[62].mxu0 }
 0x1e4   : > { %v2658_v27 = vpop.f32.mrb[63].mxu0 }
 0x1e6   : > { %1516 = vxpose.xlu1.b32.end [2/2] (short) (narrow) %v1479_v26, 16 }
 0x1e9   : > { %v1484_v28 = vpop.f32.mrb[64].mxu0 }
 0x1ea   : > { %v412_v29 = vpop.trf.xlu0  ;;  %1547 = vxpose.xlu0.b32.start [1/2] (short) (narrow) %v1484_v28, 16  ;;  %v2661_v30 = vpop.f32.mrb[65].mxu0 }
 0x1eb   : > { %v1487_v31 = vpop.f32.mrb[66].mxu0 }
 0x1ec   : > { %v2662_v32 = vpop.f32.mrb[67].mxu0 }
 0x1ee   : > { %v413_v33 = vpop.trf.xlu0  ;;  %1548 = vxpose.xlu0.b32.end [2/2] (short) (narrow) %v1487_v31, 16 }
 0x1ef   : > { %v556_v34 = vpack.c.bf16 %v413_v33, %v412_v29  ;;  %v2848_v33 = vld [vmem:[#allocation2 + $0x18] sm:$0xff]  }
 0x1f1   : > { %2546 = vmatmul.mubr.msk.bf16.vlgmr.msra.gmra.mrb[0].mxu1 %vm307_vm1, %v556_v34  ;;  %v1492_v36 = vpop.f32.mrb[68].mxu0 }
 0x1f2   : > { %v444_v37 = vpop.trf.xlu1  ;;  %1579 = vxpose.xlu1.b32.start [1/2] (short) (narrow) %v1492_v36, 16  ;;  %v2665_v38 = vpop.f32.mrb[69].mxu0  ;;  %2549 = vmatprep.mubr.msk.bf16.mxu1 %vm3043_vm0, %v3042_v0 }
 0x1f3   : > { %v1495_v39 = vpop.f32.mrb[70].mxu0  ;;  %2588 = vmatpush3.bf16.msra.mxu1 %v2846_v35  ;;  %v2849_v35 = vld [vmem:[#allocation2 + $0x20] sm:$0xff]  }
 0x1f4   : > { %v2666_v40 = vpop.f32.mrb[71].mxu0  ;;  %2631 = vmatprep.subr.bf16.mxu1 %v3042_v0 }
 0x1f6   : > { %v445_v41 = vpop.trf.xlu1  ;;  %1580 = vxpose.xlu1.b32.end [2/2] (short) (narrow) %v1495_v39, 16 }
 0x1f7   : > { %v557_v42 = vpack.c.bf16 %v445_v41, %v444_v37 }
 0x1f9   : > { %2550 = vmatmul.mubr.msk.bf16.gmra.mrb[4].mxu1 %vm307_vm1, %v557_v42  ;;  %v1500_v43 = vpop.f32.mrb[72].mxu0 }
 0x1fa   : > { %v476_v44 = vpop.trf.xlu0  ;;  %1611 = vxpose.xlu0.b32.start [1/2] (short) (narrow) %v1500_v43, 16  ;;  %v2669_v45 = vpop.f32.mrb[73].mxu0  ;;  %2553 = vmatprep.mubr.msk.bf16.mxu1 %vm3043_vm0, %v3042_v0 }
 0x1fb   : > { %v1503_v46 = vpop.f32.mrb[74].mxu0 }
 0x1fc   : > { %v2670_v47 = vpop.f32.mrb[75].mxu0 }
 0x1fe   : > { %v477_v48 = vpop.trf.xlu0  ;;  %1612 = vxpose.xlu0.b32.end [2/2] (short) (narrow) %v1503_v46, 16 }
 0x1ff   : > { %v558_v49 = vpack.c.bf16 %v477_v48, %v476_v44 }
 0x201   : > { %2554 = vmatmul.mubr.msk.bf16.gmra.mrb[8].mxu1 %vm307_vm1, %v558_v49  ;;  %v1508_v50 = vpop.f32.mrb[76].mxu0 }
 0x202   : > { %v508_v51 = vpop.trf.xlu1  ;;  %1643 = vxpose.xlu1.b32.start [1/2] (short) (narrow) %v1508_v50, 16  ;;  %v2673_v52 = vpop.f32.mrb[77].mxu0  ;;  %2557 = vmatprep.mubr.msk.bf16.mxu1 %vm3043_vm0, %v3042_v0 }
 0x203   : > { %v1511_v53 = vpop.f32.mrb[78].mxu0 }
 0x204   : > { %v2674_v54 = vpop.f32.mrb[79].mxu0 }
 0x206   : > { %v509_v55 = vpop.trf.xlu1  ;;  %1644 = vxpose.xlu1.b32.end [2/2] (short) (narrow) %v1511_v53, 16 }
 0x207   : > { %v559_v56 = vpack.c.bf16 %v509_v55, %v508_v51 }
 0x209   : > { %2558 = vmatmul.mubr.msk.bf16.gmra.mrb[12].mxu1 %vm307_vm1, %v559_v56  ;;  %v2701_v57 = vpop.f32.mrb[80].mxu0 }
 0x20a   : > { %v540_v58 = vpop.trf.xlu0  ;;  %v1853_v59 = vpop.f32.mrb[81].mxu0  ;;  %2561 = vmatprep.mubr.msk.bf16.mxu1 %vm3043_vm0, %v3042_v0 }
 0x20b   : > { %v2798_v60 = vpack.i.bf16 %v2701_v57, %v1853_v59  ;;  %v2702_v61 = vpop.f32.mrb[82].mxu0 }
 0x20c   : > { %v1856_v62 = vpop.f32.mrb[83].mxu0 }
 0x20d   : > { %v2800_v63 = vpack.i.bf16 %v2702_v61, %v1856_v62  ;;  %2799 = vxpose.xlu0.b32.start [1/2] (short) (narrow) %v2798_v60, 16 }
 0x20e   : > { %v541_v1 = vpop.trf.xlu0 }
 0x20f   : > { %v560_v2 = vpack.c.bf16 %v541_v1, %v540_v58 }
 0x211   : > { %2562 = vmatmul.mubr.msk.bf16.gmra.mrb[16].mxu1 %vm307_vm1, %v560_v2  ;;  %2801 = vxpose.xlu0.b32.end [2/2] (short) (narrow) %v2800_v63, 16  ;;  %v2705_v3 = vpop.f32.mrb[84].mxu0 }
 0x212   : > { %v783_v4 = vpop.trf.xlu1  ;;  %v1869_v5 = vpop.f32.mrb[85].mxu0  ;;  %2589 = vmatprep.mubr.msk.bf16.mxu1 %vm3043_vm0, %v3042_v0 }
 0x213   : > { %v2812_v6 = vpack.i.bf16 %v2705_v3, %v1869_v5  ;;  %v2706_v7 = vpop.f32.mrb[86].mxu0 }
 0x214   : > { %v1872_v8 = vpop.f32.mrb[87].mxu0 }
 0x215   : > { %v2814_v9 = vpack.i.bf16 %v2706_v7, %v1872_v8  ;;  %2813 = vxpose.xlu1.b32.start [1/2] (short) (narrow) %v2812_v6, 16 }
 0x216   : > { %v784_v10 = vpop.trf.xlu1 }
 0x217   : > { %v927_v12 = vpack.c.bf16 %v784_v10, %v783_v4 }
 0x219   : > { %2590 = vmatmul.mubr.msk.bf16.vlgmr.msra.gmra.mrb[20].mxu1 %vm307_vm1, %v927_v12  ;;  %2815 = vxpose.xlu1.b32.end [2/2] (short) (narrow) %v2814_v9, 16  ;;  %v2709_v13 = vpop.f32.mrb[88].mxu0 }
 0x21a   : > { %v815_v14 = vpop.trf.xlu0  ;;  %v1885_v15 = vpop.f32.mrb[89].mxu0  ;;  %2593 = vmatprep.mubr.msk.bf16.mxu1 %vm3043_vm0, %v3042_v0  ;;  %2632 = vmatpush3.bf16.msra.mxu1 %v2847_v11 }
 0x21b   : > { %v2826_v16 = vpack.i.bf16 %v2709_v13, %v1885_v15  ;;  %v2710_v17 = vpop.f32.mrb[90].mxu0  ;;  %2675 = vmatprep.subr.bf16.mxu1 %v3042_v0 }
 0x21c   : > { %v1888_v18 = vpop.f32.mrb[91].mxu0 }
 0x21d   : > { %2827 = vxpose.xlu0.b32.start [1/2] (short) (narrow) %v2826_v16, 16  ;;  %v2828_v19 = vpack.i.bf16 %v2710_v17, %v1888_v18 }
 0x21e   : > { %v816_v20 = vpop.trf.xlu0 }
 0x21f   : > { %v928_v21 = vpack.c.bf16 %v816_v20, %v815_v14 }
 0x221   : > { %2594 = vmatmul.mubr.msk.bf16.gmra.mrb[24].mxu1 %vm307_vm1, %v928_v21  ;;  %2829 = vxpose.xlu0.b32.end [2/2] (short) (narrow) %v2828_v19, 16 }
 0x222   : > { %v847_v22 = vpop.trf.xlu1  ;;  %2597 = vmatprep.mubr.msk.bf16.mxu1 %vm3043_vm0, %v3042_v0 }
 0x226   : > { %v848_v23 = vpop.trf.xlu1 }
 0x227   : > { %v929_v24 = vpack.c.bf16 %v848_v23, %v847_v22 }
 0x229   : > { %2598 = vmatmul.mubr.msk.bf16.gmra.mrb[28].mxu1 %vm307_vm1, %v929_v24 }
 0x22a   : > { %v879_v25 = vpop.trf.xlu0  ;;  %2601 = vmatprep.mubr.msk.bf16.mxu1 %vm3043_vm0, %v3042_v0 }
 0x22e   : > { %v880_v26 = vpop.trf.xlu0 }
 0x22f   : > { %v930_v27 = vpack.c.bf16 %v880_v26, %v879_v25 }
 0x231   : > { %2602 = vmatmul.mubr.msk.bf16.gmra.mrb[32].mxu1 %vm307_vm1, %v930_v27 }
 0x232   : > { %v911_v28 = vpop.trf.xlu1  ;;  %2605 = vmatprep.mubr.msk.bf16.mxu1 %vm3043_vm0, %v3042_v0 }
 0x236   : > { %v912_v29 = vpop.trf.xlu1 }
 0x237   : > { %v931_v30 = vpack.c.bf16 %v912_v29, %v911_v28 }
 0x239   : > { %2606 = vmatmul.mubr.msk.bf16.gmra.mrb[36].mxu1 %vm307_vm1, %v931_v30 }
 0x23a   : > { %v1157_v31 = vpop.trf.xlu0  ;;  %2633 = vmatprep.mubr.msk.bf16.mxu1 %vm3043_vm0, %v3042_v0 }
 0x23e   : > { %v1158_v32 = vpop.trf.xlu0 }
 0x23f   : > { %v1301_v34 = vpack.c.bf16 %v1158_v32, %v1157_v31 }
 0x241   : > { %2634 = vmatmul.mubr.msk.bf16.vlgmr.msra.gmra.mrb[40].mxu1 %vm307_vm1, %v1301_v34 }
 0x242   : > { %v1189_v36 = vpop.trf.xlu1  ;;  %2637 = vmatprep.mubr.msk.bf16.mxu1 %vm3043_vm0, %v3042_v0  ;;  %2676 = vmatpush3.bf16.msra.mxu1 %v2848_v33 }
 0x243   : > { %2711 = vmatprep.subr.bf16.mxu1 %v2849_v35 }
 0x246   : > { %v1190_v37 = vpop.trf.xlu1 }
 0x247   : > { %v1302_v38 = vpack.c.bf16 %v1190_v37, %v1189_v36 }
 0x249   : > { %2638 = vmatmul.mubr.msk.bf16.gmra.mrb[44].mxu1 %vm307_vm1, %v1302_v38 }
 0x24a   : > { %v1221_v39 = vpop.trf.xlu0  ;;  %2641 = vmatprep.mubr.msk.bf16.mxu1 %vm3043_vm0, %v3042_v0 }
 0x24e   : > { %v1222_v40 = vpop.trf.xlu0 }
 0x24f   : > { %v1303_v41 = vpack.c.bf16 %v1222_v40, %v1221_v39 }
 0x251   : > { %2642 = vmatmul.mubr.msk.bf16.gmra.mrb[48].mxu1 %vm307_vm1, %v1303_v41 }
 0x252   : > { %v1253_v42 = vpop.trf.xlu1  ;;  %2645 = vmatprep.mubr.msk.bf16.mxu1 %vm3043_vm0, %v3042_v0 }
 0x256   : > { %v1254_v43 = vpop.trf.xlu1 }
 0x257   : > { %v1304_v44 = vpack.c.bf16 %v1254_v43, %v1253_v42 }
 0x259   : > { %2646 = vmatmul.mubr.msk.bf16.gmra.mrb[52].mxu1 %vm307_vm1, %v1304_v44 }
 0x25a   : > { %v1285_v45 = vpop.trf.xlu0  ;;  %2649 = vmatprep.mubr.msk.bf16.mxu1 %vm3043_vm0, %v3042_v0 }
 0x25e   : > { %v1286_v46 = vpop.trf.xlu0 }
 0x25f   : > { %v1305_v47 = vpack.c.bf16 %v1286_v46, %v1285_v45 }
 0x261   : > { %2650 = vmatmul.mubr.msk.bf16.gmra.mrb[56].mxu1 %vm307_vm1, %v1305_v47 }
 0x262   : > { %v1531_v48 = vpop.trf.xlu1  ;;  %2677 = vmatprep.mubr.msk.bf16.mxu1 %vm3043_vm0, %v3042_v0 }
 0x266   : > { %v1532_v49 = vpop.trf.xlu1 }
 0x267   : > { %v1675_v50 = vpack.c.bf16 %v1532_v49, %v1531_v48 }
 0x269   : > { %2678 = vmatmul.mubr.msk.bf16.vlgmr.msra.gmra.mrb[60].mxu1 %vm307_vm1, %v1675_v50 }
 0x26a   : > { %v1563_v51 = vpop.trf.xlu0  ;;  %2681 = vmatprep.mubr.msk.bf16.mxu1 %vm3043_vm0, %v3042_v0  ;;  %2712 = vmatpush3.bf16.msra.mxu1 %v2849_v35 }
 0x26e   : > { %v1564_v52 = vpop.trf.xlu0 }
 0x26f   : > { %v1676_v53 = vpack.c.bf16 %v1564_v52, %v1563_v51 }
 0x271   : > { %2682 = vmatmul.mubr.msk.bf16.gmra.mrb[64].mxu1 %vm307_vm1, %v1676_v53 }
 0x272   : > { %v1595_v54 = vpop.trf.xlu1  ;;  %2685 = vmatprep.mubr.msk.bf16.mxu1 %vm3043_vm0, %v3042_v0 }
 0x276   : > { %v1596_v55 = vpop.trf.xlu1 }
 0x277   : > { %v1677_v56 = vpack.c.bf16 %v1596_v55, %v1595_v54 }
 0x279   : > { %2686 = vmatmul.mubr.msk.bf16.gmra.mrb[68].mxu1 %vm307_vm1, %v1677_v56 }
 0x27a   : > { %v1627_v57 = vpop.trf.xlu0  ;;  %2689 = vmatprep.mubr.msk.bf16.mxu1 %vm3043_vm0, %v3042_v0 }
 0x27e   : > { %v1628_v58 = vpop.trf.xlu0 }
 0x27f   : > { %v1678_v59 = vpack.c.bf16 %v1628_v58, %v1627_v57 }
 0x281   : > { %2690 = vmatmul.mubr.msk.bf16.gmra.mrb[72].mxu1 %vm307_vm1, %v1678_v59 }
 0x282   : > { %v1659_v60 = vpop.trf.xlu1  ;;  %2693 = vmatprep.mubr.msk.bf16.mxu1 %vm3043_vm0, %v3042_v0 }
 0x286   : > { %v1660_v61 = vpop.trf.xlu1 }
 0x287   : > { %v1679_v62 = vpack.c.bf16 %v1660_v61, %v1659_v60 }
 0x289   : > { %2694 = vmatmul.mubr.msk.bf16.gmra.mrb[76].mxu1 %vm307_vm1, %v1679_v62 }
 0x28d   : > { %v2802_v63 = vpop.trf.xlu0 }
 0x28e   : > { %v2806_v1 = vunpack.i.h.bf16 %v2802_v63  ;;  %v2803_v2 = vunpack.i.l.bf16 %v2802_v63 }
 0x291   : > { %v2807_v3 = vpop.trf.xlu0 }
 0x292   : > { %v2811_v4 = vunpack.i.h.bf16 %v2807_v3  ;;  %v2808_v5 = vunpack.i.l.bf16 %v2807_v3 }
 0x294   : > { %v2093_v6 = vpack.c.bf16 %v2811_v4, %v2806_v1  ;;  %v2092_v7 = vpack.c.bf16 %v2808_v5, %v2803_v2 }
 0x295   : > { %v2816_v8 = vpop.trf.xlu1 }
 0x296   : > { %2713 = vmatprep.mubr.msk.bf16.mxu1 %vm307_vm1, %v2092_v7  ;;  %v2820_v9 = vunpack.i.h.bf16 %v2816_v8  ;;  %v2817_v10 = vunpack.i.l.bf16 %v2816_v8 }
 0x297   : > { %2714 = vmatmul.mubr.msk.bf16.vlgmr.msra.gmra.mrb[80].mxu1 %vm307_vm1, %v2093_v6 }
 0x299   : > { %v2821_v0 = vpop.trf.xlu1 }
 0x29a   : > { %v2825_v11 = vunpack.i.h.bf16 %v2821_v0  ;;  %v2822_v12 = vunpack.i.l.bf16 %v2821_v0 }
 0x29c   : > { %v2094_v13 = vpack.c.bf16 %v2822_v12, %v2817_v10  ;;  %v2095_v14 = vpack.c.bf16 %v2825_v11, %v2820_v9 }
 0x29d   : > { %v2830_v15 = vpop.trf.xlu0 }
 0x29e   : > { %2717 = vmatprep.mubr.msk.bf16.mxu1 %vm307_vm1, %v2094_v13  ;;  %v2834_v16 = vunpack.i.h.bf16 %v2830_v15  ;;  %v2831_v17 = vunpack.i.l.bf16 %v2830_v15 }
 0x29f   : > { %2718 = vmatmul.mubr.msk.bf16.gmra.mrb[84].mxu1 %vm307_vm1, %v2095_v14 }
 0x2a1   : > { %v2835_v18 = vpop.trf.xlu0 }
 0x2a2   : > { %v2839_v19 = vunpack.i.h.bf16 %v2835_v18  ;;  %v2836_v20 = vunpack.i.l.bf16 %v2835_v18 }
 0x2a4   : > { %v2096_v21 = vpack.c.bf16 %v2836_v20, %v2831_v17  ;;  %v2097_v22 = vpack.c.bf16 %v2839_v19, %v2834_v16 }
 0x2a6   : > { %2721 = vmatprep.mubr.msk.bf16.mxu1 %vm307_vm1, %v2096_v21 }
 0x2a7   : > { %2722 = vmatmul.mubr.msk.bf16.gmra.mrb[88].mxu1 %vm307_vm1, %v2097_v22 }
 0x2c4   : > { %v618_v23 = vpop.f32.mrb[0].mxu1 }
 0x2c5   : > { %v2547_v24 = vpop.f32.mrb[1].mxu1  ;;  %v657_v33 = vmul.f32 %v618_v23, %v618_v23 }
 0x2c6   : > { %v621_v25 = vpop.f32.mrb[2].mxu1 }
 0x2c7   : > { %v2548_v26 = vpop.f32.mrb[3].mxu1  ;;  %v658_v35 = vmul.f32 %v621_v25, %v621_v25 }
 0x2cc   : > { %v626_v27 = vpop.f32.mrb[4].mxu1 }
 0x2cd   : > { %v661_v28 = vmul.f32 %v626_v27, %v618_v23  ;;  %v2551_v29 = vpop.f32.mrb[5].mxu1  ;;  %v659_v41 = vmul.f32 %v626_v27, %v626_v27 }
 0x2ce   : > { %v629_v30 = vpop.f32.mrb[6].mxu1 }
 0x2cf   : > { %v662_v31 = vmul.f32 %v629_v30, %v621_v25  ;;  %v2552_v32 = vpop.f32.mrb[7].mxu1  ;;  %v660_v43 = vmul.f32 %v629_v30, %v629_v30 }
 0x2d4   : > { %v634_v34 = vpop.f32.mrb[8].mxu1 }
 0x2d5   : > { %v663_v36 = vsub.f32 %v634_v34, %v657_v33  ;;  %v2555_v37 = vpop.f32.mrb[9].mxu1 }
 0x2d6   : > { %v637_v38 = vpop.f32.mrb[10].mxu1 }
 0x2d7   : > { %v664_v39 = vsub.f32 %v637_v38, %v658_v35  ;;  %v2556_v40 = vpop.f32.mrb[11].mxu1 }
 0x2dc   : > { %v642_v42 = vpop.f32.mrb[12].mxu1 }
 0x2dd   : > { %v665_v44 = vsub.f32 %v642_v42, %v659_v41  ;;  %v2559_v45 = vpop.f32.mrb[13].mxu1 }
 0x2de   : > { %v645_v46 = vpop.f32.mrb[14].mxu1 }
 0x2df   : > { %v673_v47 = vadd.f32 %v665_v44, %v663_v36  ;;  %v666_v48 = vsub.f32 %v645_v46, %v660_v43  ;;  %v2560_v49 = vpop.f32.mrb[15].mxu1 }
 0x2e1   : > { %v675_v50 = vadd.f32 0.0009, %v673_v47  ;;  %v674_v51 = vadd.f32 %v666_v48, %v664_v39 }
 0x2e3   : > { %2850 = vrcp.f32 %v675_v50  ;;  %v676_v52 = vadd.f32 0.0009, %v674_v51 }
 0x2e4   : > { %v650_v53 = vpop.f32.mrb[16].mxu1 }
 0x2e5   : > { %2852 = vrcp.f32 %v676_v52  ;;  %v667_v54 = vsub.f32 %v650_v53, %v661_v28  ;;  %v2563_v55 = vpop.f32.mrb[17].mxu1 }
 0x2e6   : > { %v653_v56 = vpop.f32.mrb[18].mxu1 }
 0x2e7   : > { %v668_v57 = vsub.f32 %v653_v56, %v662_v31  ;;  %v2564_v58 = vpop.f32.mrb[19].mxu1  ;;  %v669_v59 = vmul.f32 2.0, %v667_v54 }
 0x2e9   : > { %v670_v60 = vmul.f32 2.0, %v668_v57  ;;  %v671_v61 = vadd.f32 0.0009, %v669_v59 }
 0x2eb   : > { %v672_v3 = vadd.f32 0.0009, %v670_v60 }
 0x2ec   : > { %v990_v62 = vpop.f32.mrb[20].mxu1 }
 0x2ed   : > { %v2851_v63 = vpop.eup %2850  ;;  %v2591_v1 = vpop.f32.mrb[21].mxu1  ;;  %v1029_v13 = vmul.f32 %v990_v62, %v990_v62 }
 0x2ee   : > { %v678_v2 = vmul.f32 %v2851_v63, %v671_v61  ;;  %v993_v4 = vpop.f32.mrb[22].mxu1 }
 0x2ef   : > { %v2853_v5 = vpop.eup %2852  ;;  %v2592_v6 = vpop.f32.mrb[23].mxu1  ;;  %v1030_v15 = vmul.f32 %v993_v4, %v993_v4 }
 0x2f0   : > { %v680_v7 = vmul.f32 %v2853_v5, %v672_v3  ;;  %v681_v45 = vmul.f32 %v678_v2, %v678_v2 }
 0x2f2   : > { %v682_v51 = vmul.f32 %v680_v7, %v680_v7  ;;  %v683_v54 = vmul.f32 %v681_v45, %v678_v2 }
 0x2f4   : > { %v998_v8 = vpop.f32.mrb[24].mxu1  ;;  %v684_v57 = vmul.f32 %v682_v51, %v680_v7 }
 0x2f5   : > { %v1033_v9 = vmul.f32 %v998_v8, %v990_v62  ;;  %v2595_v10 = vpop.f32.mrb[25].mxu1  ;;  %v1031_v21 = vmul.f32 %v998_v8, %v998_v8 }
 0x2f6   : > { %v1001_v0 = vpop.f32.mrb[26].mxu1 }
 0x2f7   : > { %v1034_v11 = vmul.f32 %v1001_v0, %v993_v4  ;;  %v2596_v12 = vpop.f32.mrb[27].mxu1  ;;  %v1032_v23 = vmul.f32 %v1001_v0, %v1001_v0 }
 0x2fc   : > { %v1006_v14 = vpop.f32.mrb[28].mxu1 }
 0x2fd   : > { %v1035_v16 = vsub.f32 %v1006_v14, %v1029_v13  ;;  %v2599_v17 = vpop.f32.mrb[29].mxu1 }
 0x2fe   : > { %v1009_v18 = vpop.f32.mrb[30].mxu1 }
 0x2ff   : > { %v1036_v19 = vsub.f32 %v1009_v18, %v1030_v15  ;;  %v2600_v20 = vpop.f32.mrb[31].mxu1 }
 0x304   : > { %v1014_v22 = vpop.f32.mrb[32].mxu1 }
 0x305   : > { %v1037_v24 = vsub.f32 %v1014_v22, %v1031_v21  ;;  %v2603_v25 = vpop.f32.mrb[33].mxu1 }
 0x306   : > { %v1017_v26 = vpop.f32.mrb[34].mxu1 }
 0x307   : > { %v1045_v27 = vadd.f32 %v1037_v24, %v1035_v16  ;;  %v1038_v28 = vsub.f32 %v1017_v26, %v1032_v23  ;;  %v2604_v29 = vpop.f32.mrb[35].mxu1 }
 0x309   : > { %v1047_v30 = vadd.f32 0.0009, %v1045_v27  ;;  %v1046_v31 = vadd.f32 %v1038_v28, %v1036_v19 }
 0x30b   : > { %2854 = vrcp.f32 %v1047_v30  ;;  %v1048_v32 = vadd.f32 0.0009, %v1046_v31 }
 0x30c   : > { %v1022_v33 = vpop.f32.mrb[36].mxu1 }
 0x30d   : > { %2856 = vrcp.f32 %v1048_v32  ;;  %v1039_v34 = vsub.f32 %v1022_v33, %v1033_v9  ;;  %v2607_v35 = vpop.f32.mrb[37].mxu1 }
 0x30e   : > { %v1025_v36 = vpop.f32.mrb[38].mxu1 }
 0x30f   : > { %v1040_v37 = vsub.f32 %v1025_v36, %v1034_v11  ;;  %v2608_v38 = vpop.f32.mrb[39].mxu1  ;;  %v1041_v39 = vmul.f32 2.0, %v1039_v34 }
 0x311   : > { %v1042_v40 = vmul.f32 2.0, %v1040_v37  ;;  %v1043_v41 = vadd.f32 0.0009, %v1041_v39 }
 0x313   : > { %v1044_v47 = vadd.f32 0.0009, %v1042_v40 }
 0x314   : > { %v1364_v42 = vpop.f32.mrb[40].mxu1 }
 0x315   : > { %v2855_v43 = vpop.eup %2854  ;;  %v2635_v44 = vpop.f32.mrb[41].mxu1  ;;  %v1403_v5 = vmul.f32 %v1364_v42, %v1364_v42 }
 0x316   : > { %v1050_v46 = vmul.f32 %v2855_v43, %v1043_v41  ;;  %v1367_v48 = vpop.f32.mrb[42].mxu1 }
 0x317   : > { %v2857_v49 = vpop.eup %2856  ;;  %v2636_v50 = vpop.f32.mrb[43].mxu1  ;;  %v1404_v8 = vmul.f32 %v1367_v48, %v1367_v48 }
 0x318   : > { %v1053_v52 = vmul.f32 %v1050_v46, %v1050_v46  ;;  %v1052_v53 = vmul.f32 %v2857_v49, %v1044_v47 }
 0x31a   : > { %v1055_v55 = vmul.f32 %v1053_v52, %v1050_v46  ;;  %v1054_v56 = vmul.f32 %v1052_v53, %v1052_v53 }
 0x31c   : > { %v1057_v58 = vmul.f32 %v1055_v55, %v683_v54  ;;  %v1056_v59 = vmul.f32 %v1054_v56, %v1052_v53  ;;  %v1372_v60 = vpop.f32.mrb[44].mxu1 }
 0x31d   : > { %v1407_v61 = vmul.f32 %v1372_v60, %v1364_v42  ;;  %v2639_v62 = vpop.f32.mrb[45].mxu1  ;;  %v1405_v12 = vmul.f32 %v1372_v60, %v1372_v60 }
 0x31e   : > { %v1058_v63 = vmul.f32 %v1056_v59, %v684_v57  ;;  %v1375_v1 = vpop.f32.mrb[46].mxu1 }
 0x31f   : > { %v1408_v3 = vmul.f32 %v1375_v1, %v1367_v48  ;;  %v2640_v4 = vpop.f32.mrb[47].mxu1  ;;  %v1406_v7 = vmul.f32 %v1375_v1, %v1375_v1 }
 0x324   : > { %v1380_v6 = vpop.f32.mrb[48].mxu1 }
 0x325   : > { %v1409_v9 = vsub.f32 %v1380_v6, %v1403_v5  ;;  %v2643_v10 = vpop.f32.mrb[49].mxu1 }
 0x326   : > { %v1383_v0 = vpop.f32.mrb[50].mxu1 }
 0x327   : > { %v1410_v11 = vsub.f32 %v1383_v0, %v1404_v8  ;;  %v2644_v2 = vpop.f32.mrb[51].mxu1 }
 0x32c   : > { %v1388_v13 = vpop.f32.mrb[52].mxu1 }
 0x32d   : > { %v1411_v14 = vsub.f32 %v1388_v13, %v1405_v12  ;;  %v2647_v15 = vpop.f32.mrb[53].mxu1 }
 0x32e   : > { %v1391_v16 = vpop.f32.mrb[54].mxu1 }
 0x32f   : > { %v1419_v17 = vadd.f32 %v1411_v14, %v1409_v9  ;;  %v1412_v18 = vsub.f32 %v1391_v16, %v1406_v7  ;;  %v2648_v19 = vpop.f32.mrb[55].mxu1 }
 0x331   : > { %v1421_v20 = vadd.f32 0.0009, %v1419_v17  ;;  %v1420_v21 = vadd.f32 %v1412_v18, %v1410_v11 }
 0x333   : > { %2858 = vrcp.f32 %v1421_v20  ;;  %v1422_v22 = vadd.f32 0.0009, %v1420_v21 }
 0x334   : > { %v1396_v23 = vpop.f32.mrb[56].mxu1 }
 0x335   : > { %2860 = vrcp.f32 %v1422_v22  ;;  %v1413_v24 = vsub.f32 %v1396_v23, %v1407_v61  ;;  %v2651_v25 = vpop.f32.mrb[57].mxu1 }
 0x336   : > { %v1399_v26 = vpop.f32.mrb[58].mxu1 }
 0x337   : > { %v1414_v27 = vsub.f32 %v1399_v26, %v1408_v3  ;;  %v2652_v28 = vpop.f32.mrb[59].mxu1  ;;  %v1415_v29 = vmul.f32 2.0, %v1413_v24 }
 0x339   : > { %v1416_v30 = vmul.f32 2.0, %v1414_v27  ;;  %v1417_v31 = vadd.f32 0.0009, %v1415_v29 }
 0x33b   : > { %v1418_v36 = vadd.f32 0.0009, %v1416_v30 }
 0x33c   : > { %v1738_v32 = vpop.f32.mrb[60].mxu1 }
 0x33d   : > { %v2859_v33 = vpop.eup %2858  ;;  %v2679_v34 = vpop.f32.mrb[61].mxu1  ;;  %v1777_v53 = vmul.f32 %v1738_v32, %v1738_v32 }
 0x33e   : > { %v1424_v35 = vmul.f32 %v2859_v33, %v1417_v31  ;;  %v1741_v37 = vpop.f32.mrb[62].mxu1 }
 0x33f   : > { %v2861_v38 = vpop.eup %2860  ;;  %v2680_v39 = vpop.f32.mrb[63].mxu1  ;;  %v1778_v55 = vmul.f32 %v1741_v37, %v1741_v37 }
 0x340   : > { %v1427_v40 = vmul.f32 %v1424_v35, %v1424_v35  ;;  %v1426_v41 = vmul.f32 %v2861_v38, %v1418_v36 }
 0x342   : > { %v1429_v42 = vmul.f32 %v1427_v40, %v1424_v35  ;;  %v1428_v43 = vmul.f32 %v1426_v41, %v1426_v41 }
 0x344   : > { %v1431_v44 = vmul.f32 %v1429_v42, %v1057_v58  ;;  %v1430_v45 = vmul.f32 %v1428_v43, %v1426_v41  ;;  %v1746_v46 = vpop.f32.mrb[64].mxu1 }
 0x345   : > { %v1781_v47 = vmul.f32 %v1746_v46, %v1738_v32  ;;  %v2683_v48 = vpop.f32.mrb[65].mxu1  ;;  %v1779_v62 = vmul.f32 %v1746_v46, %v1746_v46 }
 0x346   : > { %v1432_v49 = vmul.f32 %v1430_v45, %v1058_v63  ;;  %v1749_v50 = vpop.f32.mrb[66].mxu1 }
 0x347   : > { %v1782_v51 = vmul.f32 %v1749_v50, %v1741_v37  ;;  %v2684_v52 = vpop.f32.mrb[67].mxu1  ;;  %v1780_v3 = vmul.f32 %v1749_v50, %v1749_v50 }
 0x34c   : > { %v1754_v54 = vpop.f32.mrb[68].mxu1 }
 0x34d   : > { %v1783_v56 = vsub.f32 %v1754_v54, %v1777_v53  ;;  %v2687_v57 = vpop.f32.mrb[69].mxu1 }
 0x34e   : > { %v1757_v59 = vpop.f32.mrb[70].mxu1 }
 0x34f   : > { %v1784_v60 = vsub.f32 %v1757_v59, %v1778_v55  ;;  %v2688_v61 = vpop.f32.mrb[71].mxu1 }
 0x354   : > { %v1762_v1 = vpop.f32.mrb[72].mxu1 }
 0x355   : > { %v1785_v58 = vsub.f32 %v1762_v1, %v1779_v62  ;;  %v2691_v4 = vpop.f32.mrb[73].mxu1 }
 0x356   : > { %v1765_v5 = vpop.f32.mrb[74].mxu1 }
 0x357   : > { %v1793_v6 = vadd.f32 %v1785_v58, %v1783_v56  ;;  %v1786_v8 = vsub.f32 %v1765_v5, %v1780_v3  ;;  %v2692_v63 = vpop.f32.mrb[75].mxu1 }
 0x359   : > { %v1795_v9 = vadd.f32 0.0009, %v1793_v6  ;;  %v1794_v10 = vadd.f32 %v1786_v8, %v1784_v60 }
 0x35b   : > { %2862 = vrcp.f32 %v1795_v9  ;;  %v1796_v0 = vadd.f32 0.0009, %v1794_v10 }
 0x35c   : > { %v1770_v11 = vpop.f32.mrb[76].mxu1 }
 0x35d   : > { %2864 = vrcp.f32 %v1796_v0  ;;  %v1787_v2 = vsub.f32 %v1770_v11, %v1781_v47  ;;  %v2695_v12 = vpop.f32.mrb[77].mxu1 }
 0x35e   : > { %v1773_v13 = vpop.f32.mrb[78].mxu1 }
 0x35f   : > { %v1788_v7 = vsub.f32 %v1773_v13, %v1782_v51  ;;  %v2696_v14 = vpop.f32.mrb[79].mxu1  ;;  %v1789_v15 = vmul.f32 2.0, %v1787_v2 }
 0x361   : > { %v1790_v16 = vmul.f32 2.0, %v1788_v7  ;;  %v1791_v17 = vadd.f32 0.0009, %v1789_v15 }
 0x363   : > { %v1792_v20 = vadd.f32 0.0009, %v1790_v16 }
 0x365   : > { %v2863_v18 = vpop.eup %2862 }
 0x366   : > { %v1798_v19 = vmul.f32 %v2863_v18, %v1791_v17 }
 0x367   : > { %v2865_v21 = vpop.eup %2864 }
 0x368   : > { %v1801_v22 = vmul.f32 %v1798_v19, %v1798_v19  ;;  %v1800_v23 = vmul.f32 %v2865_v21, %v1792_v20 }
 0x36a   : > { %v1803_v24 = vmul.f32 %v1801_v22, %v1798_v19  ;;  %v1802_v25 = vmul.f32 %v1800_v23, %v1800_v23  ;;  %v2715_v26 = vpop.f32.mrb[80].mxu1 }
 0x36b   : > { %v2208_v27 = vmul.f32 %v2715_v26, %v2715_v26  ;;  %v2159_v28 = vpop.f32.mrb[81].mxu1 }
 0x36c   : > { %v1805_v29 = vmul.f32 %v1803_v24, %v1431_v44  ;;  %v1804_v30 = vmul.f32 %v1802_v25, %v1800_v23  ;;  %v2206_v31 = vmul.f32 %v2159_v28, %v2159_v28  ;;  %v2210_v32 = vmul.f32 %v2715_v26, %v2159_v28  ;;  %v2716_v33 = vpop.f32.mrb[82].mxu1 }
 0x36d   : > { %v2209_v34 = vmul.f32 %v2716_v33, %v2716_v33  ;;  %v2162_v35 = vpop.f32.mrb[83].mxu1 }
 0x36e   : > { %v1806_v36 = vmul.f32 %v1804_v30, %v1432_v49  ;;  %v2240_v37 = vadd.f32 %v2208_v27, %v2206_v31  ;;  %v2207_v38 = vmul.f32 %v2162_v35, %v2162_v35  ;;  %v2211_v39 = vmul.f32 %v2716_v33, %v2162_v35 }
 0x36f   : > { %v2236_v53 = vmul.f32 2.0, %v2210_v32 }
 0x370   : > { %v2242_v40 = vadd.f32 0.0001, %v2240_v37  ;;  %v2241_v41 = vadd.f32 %v2209_v34, %v2207_v38  ;;  %v2237_v55 = vmul.f32 2.0, %v2211_v39 }
 0x371   : > { %v2238_v59 = vadd.f32 0.0001, %v2236_v53 }
 0x372   : > { %2866 = vrcp.f32 %v2242_v40  ;;  %v2243_v42 = vadd.f32 0.0001, %v2241_v41  ;;  %v2719_v43 = vpop.f32.mrb[84].mxu1  ;;  %v2239_v58 = vadd.f32 0.0001, %v2237_v55 }
 0x373   : > { %v2214_v45 = vsub.f32 %v2719_v43, %v2208_v27  ;;  %v2175_v46 = vpop.f32.mrb[85].mxu1 }
 0x374   : > { %2868 = vrcp.f32 %v2243_v42  ;;  %v2212_v47 = vsub.f32 %v2175_v46, %v2206_v31  ;;  %v2720_v44 = vpop.f32.mrb[86].mxu1 }
 0x375   : > { %v2215_v48 = vsub.f32 %v2720_v44, %v2209_v34  ;;  %v2178_v50 = vpop.f32.mrb[87].mxu1 }
 0x376   : > { %v2222_v51 = vadd.f32 %v2214_v45, %v2212_v47  ;;  %v2213_v52 = vsub.f32 %v2178_v50, %v2207_v38 }
 0x378   : > { %v2224_v54 = vadd.f32 0.0009, %v2222_v51  ;;  %v2223_v49 = vadd.f32 %v2215_v48, %v2213_v52 }
 0x37a   : > { %2870 = vrcp.f32 %v2224_v54  ;;  %v2225_v56 = vadd.f32 0.0009, %v2223_v49  ;;  %v2723_v57 = vpop.f32.mrb[88].mxu1 }
 0x37b   : > { %v2191_v60 = vpop.f32.mrb[89].mxu1  ;;  %v2258_v26 = vmul.f32 0.975, %v2723_v57 }
 0x37c   : > { %v2867_v61 = vpop.eup %2866  ;;  %2872 = vrcp.f32 %v2225_v56  ;;  %v2216_v62 = vsub.f32 %v2191_v60, %v2210_v32  ;;  %v2724_v1 = vpop.f32.mrb[90].mxu1 }
 0x37d   : > { %v2245_v3 = vmul.f32 %v2867_v61, %v2238_v59  ;;  %v2194_v4 = vpop.f32.mrb[91].mxu1  ;;  %v2259_v30 = vmul.f32 0.975, %v2724_v1 }
 0x37e   : > { %v2869_v5 = vpop.eup %2868  ;;  %v2217_v6 = vsub.f32 %v2194_v4, %v2211_v39  ;;  %v2218_v63 = vmul.f32 2.0, %v2216_v62 }
 0x37f   : > { %v2247_v8 = vmul.f32 %v2869_v5, %v2239_v58  ;;  %v2248_v13 = vmul.f32 %v2245_v3, %v2245_v3 }
 0x380   : > { %v2219_v9 = vmul.f32 2.0, %v2217_v6  ;;  %v2220_v10 = vadd.f32 0.0009, %v2218_v63 }
 0x381   : > { %v2249_v15 = vmul.f32 %v2247_v8, %v2247_v8  ;;  %v2250_v18 = vmul.f32 %v2248_v13, %v2245_v3 }
 0x382   : > { %v2221_v2 = vadd.f32 0.0009, %v2219_v9 }
 0x383   : > { %v2251_v21 = vmul.f32 %v2249_v15, %v2247_v8 }
 0x384   : > { %v2871_v0 = vpop.eup %2870 }
 0x385   : > { %v2227_v11 = vmul.f32 %v2871_v0, %v2220_v10 }
 0x386   : > { %v2873_v12 = vpop.eup %2872 }
 0x387   : > { %v2230_v7 = vmul.f32 %v2227_v11, %v2227_v11  ;;  %v2229_v14 = vmul.f32 %v2873_v12, %v2221_v2 }
 0x389   : > { %v2232_v16 = vmul.f32 %v2230_v7, %v2227_v11  ;;  %v2231_v17 = vmul.f32 %v2229_v14, %v2229_v14 }
 0x38b   : > { %v2234_v19 = vmul.f32 %v2232_v16, %v1805_v29  ;;  %v2233_v20 = vmul.f32 %v2231_v17, %v2229_v14 }
 0x38d   : > { %v2235_v22 = vmul.f32 %v2233_v20, %v1806_v36  ;;  %v2252_v23 = vmul.f32 %v2250_v18, %v2234_v19 }
 0x38f   : > { %v2253_v24 = vmul.f32 %v2251_v21, %v2235_v22  ;;  %v2254_v25 = vsub.f32 1.0, %v2252_v23 }
 0x391   : > { %v2255_v27 = vsub.f32 1.0, %v2253_v24  ;;  %v2256_v28 = vmul.f32 0.025, %v2254_v25 }
 0x393   : > { %v2257_v31 = vmul.f32 0.025, %v2255_v27  ;;  %v2260_v32 = vadd.f32 %v2258_v26, %v2256_v28 }
 0x395   : > { %v2261_v33 = vadd.f32 %v2259_v30, %v2257_v31  ;;  %v2262_v34 = vmul.f32 200.0, %v2260_v32 }
 0x397   : > { %v2263_v35 = vmul.f32 200.0, %v2261_v33  ;;  %v2264_v37 = vsel %vm307_vm1, %v2262_v34, 0.0 }
 0x399   : > { %v2265_v29 = vsel %vm307_vm1, %v2263_v35, 0.0 }
 0x39a   : > { %v2266_v38 = vadd.f32 %v2265_v29, %v2264_v37 }
 0x39c   : > { %2267 = vadd.xlane.f32.xlu1 %v2266_v38 }
 0x429   : > { %v2268_v36 = vpop.xlane.xlu1 %2267 }
 0x42a   : > { %v2269_v39 = vrot.slane %v2268_v36, 4 }
 0x42c   : > { %v2270_v40 = vadd.f32 %v2269_v39, %v2268_v36 }
 0x42e   : > { %v2271_v41 = vrot.slane %v2270_v40, 2 }
 0x430   : > { %v2272_v42 = vadd.f32 %v2271_v41, %v2270_v40 }
 0x432   : > { %v2273_v43 = vrot.slane %v2272_v42, 1 }
 0x434   : > { %v2274_v45 = vadd.f32 %v2273_v43, %v2272_v42 }
 0x436   : > { %2725 = vpush %v2274_v45 }
 0x467   : > { %s2726_s27 = spop %2725 }
 0x468   : > { %v2276_v46 = vstv %s2726_s27 }
 0x469   : > { %2278 = vst.msk [vmem:[%s277_s10] sm:$0x1] %vm2277_vm2, %v2276_v46 }
 0x46a PF: > { %s3487_s2 = sld [smem:[#allocation11_spill]]  ;;  %p13_p4 = scmp.ge.s32.totalorder %s3091_s20, 4  }
 0x46b   : > { %s3488_s15 = smov %s3024_s16  ;;  %s3489_s16 = smov %s3028_s17 }
 0x46c   : > { %s3491_s18 = smov %s3091_s20  ;;  %15 = sbr.rel (!%p13_p4) target bundleno = 6 (0x6), region = 102 }
 0x470   : > { %s3490_s17 = smov %s3487_s2 }
 0x473   :  { %2296 = vsyncpa [#allocation3], 1 }
 0x474   :  { %2298 = vsyncpa [#allocation3 + $0x1], 1 }
 0x475   :  { %2299 = vsyncpa [#allocation5], 1 }

</bundles_post_ra>
